<compile_context>
chip_gen: v7x
topology: tpu7x:2x2x1
jax: 0.10.0
libtpu: 0.0.40
codegen_flags: <defaults>
</compile_context>

<pallas_src>
import functools

import jax
import jax.numpy as jnp
from jax.experimental import pallas as pl
from jax.experimental.pallas import tpu as pltpu


# -----------------------------------------------------------------------------
# tiling helpers
# -----------------------------------------------------------------------------
def _pick_tile(dim, preferred):
    """Largest multiple of 8 (<= preferred) dividing dim, else the full dim."""
    if dim <= preferred:
        return dim
    t = (preferred // 8) * 8
    while t >= 8:
        if dim % t == 0:
            return t
        t -= 8
    return dim


def _pick_lane_tile(dim, preferred):
    """Largest multiple of 128 (<= preferred) dividing dim, else the full dim."""
    if dim <= preferred:
        return dim
    t = (preferred // 128) * 128
    while t >= 128:
        if dim % t == 0:
            return t
        t -= 128
    return dim


def _heads_per_step(n_head, d_head, cap=512):
    """Largest divisor of n_head with hps * d_head <= cap (amortize grid overhead)."""
    best = 1
    for c in range(1, n_head + 1):
        if n_head % c == 0 and c * d_head <= cap:
            best = c
    return best


# -----------------------------------------------------------------------------
# Kernel 1: head-major projection  out[h] = x @ w[h] + b[h]
#   x: (M, d_model), w: (H, d_model, d_head), b: (H, 1, d_head)
#   out: (H, M, d_head)  -- head split happens in the out_spec (rectangular DMA)
# -----------------------------------------------------------------------------
def _proj_kernel(x_ref, w_ref, b_ref, o_ref, acc_ref, *, hps):
    kk = pl.program_id(2)

    @pl.when(kk == 0)
    def _():
        acc_ref[...] = jnp.zeros_like(acc_ref)

    xb = x_ref[...].astype(jnp.bfloat16)          # bf16 MXU operands, f32 accum
    for g in range(hps):                          # small static head group
        acc_ref[g] += jnp.dot(xb, w_ref[g].astype(jnp.bfloat16),
                              preferred_element_type=jnp.float32)

    @pl.when(kk == pl.num_programs(2) - 1)
    def _():
        o_ref[...] = (acc_ref[...] + b_ref[...]).astype(o_ref.dtype)


def project_heads(x2d, w, b, *, tm_pref=512, tk_pref=1024):
    m, kdim = x2d.shape
    n_head, _, d_out = w.shape
    tm = _pick_tile(m, tm_pref)
    tk = _pick_lane_tile(kdim, tk_pref)
    hps = _heads_per_step(n_head, d_out)
    grid = (m // tm, n_head // hps, kdim // tk)
    kernel = functools.partial(_proj_kernel, hps=hps)
    return pl.pallas_call(
        kernel,
        out_shape=jax.ShapeDtypeStruct((n_head, m, d_out), x2d.dtype),
        grid=grid,
        in_specs=[
            pl.BlockSpec((tm, tk), lambda i, hb, k: (i, k)),
            pl.BlockSpec((hps, tk, d_out), lambda i, hb, k: (hb, k, 0)),
            pl.BlockSpec((hps, 1, d_out), lambda i, hb, k: (hb, 0, 0)),
        ],
        out_specs=pl.BlockSpec((hps, tm, d_out), lambda i, hb, k: (hb, i, 0)),
        scratch_shapes=[pltpu.VMEM((hps, tm, d_out), jnp.float32)],
        compiler_params=pltpu.CompilerParams(
            dimension_semantics=("parallel", "parallel", "arbitrary")),
    )(x2d, w, b)


# -----------------------------------------------------------------------------
# Kernel 1b: fused QKV projection (self-attention): one activation read,
#   three head-major outputs written by out_specs (no wrapper concat / slices).
# -----------------------------------------------------------------------------
def _proj_qkv_kernel(x_ref, wq_ref, wk_ref, wv_ref, bq_ref, bk_ref, bv_ref,
                     q_ref, k_ref, v_ref, accq, acck, accv, *, hps):
    kk = pl.program_id(2)

    @pl.when(kk == 0)
    def _():
        accq[...] = jnp.zeros_like(accq)
        acck[...] = jnp.zeros_like(acck)
        accv[...] = jnp.zeros_like(accv)

    xb = x_ref[...].astype(jnp.bfloat16)
    for g in range(hps):
        accq[g] += jnp.dot(xb, wq_ref[g].astype(jnp.bfloat16),
                           preferred_element_type=jnp.float32)
        acck[g] += jnp.dot(xb, wk_ref[g].astype(jnp.bfloat16),
                           preferred_element_type=jnp.float32)
        accv[g] += jnp.dot(xb, wv_ref[g].astype(jnp.bfloat16),
                           preferred_element_type=jnp.float32)

    @pl.when(kk == pl.num_programs(2) - 1)
    def _():
        q_ref[...] = (accq[...] + bq_ref[...]).astype(q_ref.dtype)
        k_ref[...] = (acck[...] + bk_ref[...]).astype(k_ref.dtype)
        v_ref[...] = (accv[...] + bv_ref[...]).astype(v_ref.dtype)


def project_qkv_heads(x2d, wq, wk, wv, bq, bk, bv, *, tm_pref=512, tk_pref=512):
    m, kdim = x2d.shape
    n_head, _, d_k = wq.shape
    d_v = wv.shape[2]
    tm = _pick_tile(m, tm_pref)
    tk = _pick_lane_tile(kdim, tk_pref)
    hps = _heads_per_step(n_head, max(d_k, d_v))
    grid = (m // tm, n_head // hps, kdim // tk)
    kernel = functools.partial(_proj_qkv_kernel, hps=hps)
    return pl.pallas_call(
        kernel,
        out_shape=(
            jax.ShapeDtypeStruct((n_head, m, d_k), x2d.dtype),
            jax.ShapeDtypeStruct((n_head, m, d_k), x2d.dtype),
            jax.ShapeDtypeStruct((n_head, m, d_v), x2d.dtype),
        ),
        grid=grid,
        in_specs=[
            pl.BlockSpec((tm, tk), lambda i, hb, k: (i, k)),
            pl.BlockSpec((hps, tk, d_k), lambda i, hb, k: (hb, k, 0)),
            pl.BlockSpec((hps, tk, d_k), lambda i, hb, k: (hb, k, 0)),
            pl.BlockSpec((hps, tk, d_v), lambda i, hb, k: (hb, k, 0)),
            pl.BlockSpec((hps, 1, d_k), lambda i, hb, k: (hb, 0, 0)),
            pl.BlockSpec((hps, 1, d_k), lambda i, hb, k: (hb, 0, 0)),
            pl.BlockSpec((hps, 1, d_v), lambda i, hb, k: (hb, 0, 0)),
        ],
        out_specs=(
            pl.BlockSpec((hps, tm, d_k), lambda i, hb, k: (hb, i, 0)),
            pl.BlockSpec((hps, tm, d_k), lambda i, hb, k: (hb, i, 0)),
            pl.BlockSpec((hps, tm, d_v), lambda i, hb, k: (hb, i, 0)),
        ),
        scratch_shapes=[
            pltpu.VMEM((hps, tm, d_k), jnp.float32),
            pltpu.VMEM((hps, tm, d_k), jnp.float32),
            pltpu.VMEM((hps, tm, d_v), jnp.float32),
        ],
        compiler_params=pltpu.CompilerParams(
            dimension_semantics=("parallel", "parallel", "arbitrary")),
    )(x2d, wq, wk, wv, bq, bk, bv)


# -----------------------------------------------------------------------------
# Kernel 2a: attention WITH probability output (PyTorch-parity path).
#   Grid (head, batch, q-tile), all parallel.  Per step: one head/batch's K/V
#   and one (tq, Lk) probability tile -> VMEM bounded; attn written lane-dense.
# -----------------------------------------------------------------------------
def _attn_probs_kernel(*refs, inv_temp, has_mask):
    if has_mask:
        q_ref, k_ref, v_ref, m_ref, o_ref, attn_ref = refs
    else:
        q_ref, k_ref, v_ref, o_ref, attn_ref = refs
        m_ref = None

    q = q_ref[0].astype(jnp.bfloat16)             # (tq, d_k)
    kb = k_ref[0].astype(jnp.bfloat16)            # (Lk, d_k)
    s = jax.lax.dot_general(q, kb, (((1,), (1,)), ((), ())),
                            preferred_element_type=jnp.float32) * inv_temp
    if m_ref is not None:
        s = jnp.where(m_ref[0] > 0, -jnp.inf, s)  # masked_fill(mask, -inf)
    s_max = jnp.max(s, axis=-1, keepdims=True)
    e = jnp.exp(s - s_max)
    p = e / jnp.sum(e, axis=-1, keepdims=True)    # exact division for parity
    attn_ref[0] = p.astype(attn_ref.dtype)
    o = jnp.dot(p.astype(jnp.bfloat16), v_ref[0].astype(jnp.bfloat16),
                preferred_element_type=jnp.float32)
    o_ref[0] = o.astype(o_ref.dtype)


def attention_with_probs(qh, kh, vh, sz_b, len_q, len_k, temperature,
                         mask=None, *, tq_pref=128):
    n_head, _, d_k = qh.shape
    d_v = vh.shape[2]
    tq = _pick_tile(len_q, tq_pref)
    qtiles = len_q // tq
    has_mask = mask is not None
    kernel = functools.partial(_attn_probs_kernel,
                               inv_temp=1.0 / float(temperature),
                               has_mask=has_mask)
    in_specs = [
        pl.BlockSpec((1, tq, d_k), lambda h, b, qi: (h, b * qtiles + qi, 0)),
        pl.BlockSpec((1, len_k, d_k), lambda h, b, qi: (h, b, 0)),
        pl.BlockSpec((1, len_k, d_v), lambda h, b, qi: (h, b, 0)),
    ]
    args = [qh, kh, vh]
    if has_mask:
        in_specs.append(pl.BlockSpec((1, tq, len_k), lambda h, b, qi: (b, qi, 0)))
        args.append(mask)
    out, attn = pl.pallas_call(
        kernel,
        out_shape=(
            jax.ShapeDtypeStruct((n_head, sz_b * len_q, d_v), qh.dtype),
            jax.ShapeDtypeStruct((n_head * sz_b, len_q, len_k), qh.dtype),
        ),
        grid=(n_head, sz_b, qtiles),
        in_specs=in_specs,
        out_specs=(
            pl.BlockSpec((1, tq, d_v), lambda h, b, qi: (h, b * qtiles + qi, 0)),
            pl.BlockSpec((1, tq, len_k), lambda h, b, qi: (h * sz_b + b, qi, 0)),
        ),
        compiler_params=pltpu.CompilerParams(
            dimension_semantics=("parallel", "parallel", "parallel")),
    )(*args)
    return out, attn


# -----------------------------------------------------------------------------
# Kernel 2b: flash-style attention (no probability output): Lk grid axis with
#   online softmax; PV accumulator scaled by 1/l once at the end.
# -----------------------------------------------------------------------------
def _flash_attn_kernel(q_ref, k_ref, v_ref, o_ref, m_sc, l_sc, acc_sc, *, inv_temp):
    ki = pl.program_id(3)

    @pl.when(ki == 0)
    def _():
        m_sc[...] = jnp.full(m_sc.shape, -jnp.inf, jnp.float32)
        l_sc[...] = jnp.zeros_like(l_sc)
        acc_sc[...] = jnp.zeros_like(acc_sc)

    q = q_ref[0].astype(jnp.bfloat16)
    kb = k_ref[0].astype(jnp.bfloat16)
    s = jax.lax.dot_general(q, kb, (((1,), (1,)), ((), ())),
                            preferred_element_type=jnp.float32) * inv_temp
    m_prev = m_sc[...]
    m_new = jnp.maximum(m_prev, jnp.max(s, axis=-1, keepdims=True))
    alpha = jnp.exp(m_prev - m_new)
    p = jnp.exp(s - m_new)
    l_sc[...] = alpha * l_sc[...] + jnp.sum(p, axis=-1, keepdims=True)
    acc_sc[...] = alpha * acc_sc[...] + jnp.dot(
        p.astype(jnp.bfloat16), v_ref[0].astype(jnp.bfloat16),
        preferred_element_type=jnp.float32)
    m_sc[...] = m_new

    @pl.when(ki == pl.num_programs(3) - 1)
    def _():
        o_ref[0] = (acc_sc[...] * pl.reciprocal(l_sc[...], approx=True)
                    ).astype(o_ref.dtype)


def flash_attention(qh, kh, vh, sz_b, len_q, len_k, temperature,
                    *, tq_pref=256, tk_pref=512):
    n_head, _, d_k = qh.shape
    d_v = vh.shape[2]
    tq = _pick_tile(len_q, tq_pref)
    tlk = _pick_lane_tile(len_k, tk_pref)
    qtiles = len_q // tq
    ktiles = len_k // tlk
    kernel = functools.partial(_flash_attn_kernel, inv_temp=1.0 / float(temperature))
    return pl.pallas_call(
        kernel,
        out_shape=jax.ShapeDtypeStruct((n_head, sz_b * len_q, d_v), qh.dtype),
        grid=(n_head, sz_b, qtiles, ktiles),
        in_specs=[
            pl.BlockSpec((1, tq, d_k), lambda h, b, qi, ki: (h, b * qtiles + qi, 0)),
            pl.BlockSpec((1, tlk, d_k), lambda h, b, qi, ki: (h, b * ktiles + ki, 0)),
            pl.BlockSpec((1, tlk, d_v), lambda h, b, qi, ki: (h, b * ktiles + ki, 0)),
        ],
        out_specs=pl.BlockSpec((1, tq, d_v),
                               lambda h, b, qi, ki: (h, b * qtiles + qi, 0)),
        scratch_shapes=[
            pltpu.VMEM((tq, 1), jnp.float32),
            pltpu.VMEM((tq, 1), jnp.float32),
            pltpu.VMEM((tq, d_v), jnp.float32),
        ],
        compiler_params=pltpu.CompilerParams(
            dimension_semantics=("parallel", "parallel", "parallel", "arbitrary")),
    )(qh, kh, vh)


# -----------------------------------------------------------------------------
# Kernel 3: fused fc + residual-add + LayerNorm.  The head axis IS the
#   contraction ("arbitrary", last); w_fc stored head-major (H, d_v, d_model)
#   so the head-major attention output is consumed without any relayout.
# -----------------------------------------------------------------------------
def _fc_add_ln_kernel(o_ref, w_ref, b_ref, res_ref, g_ref, beta_ref,
                      out_ref, acc_ref, *, hg, eps):
    j = pl.program_id(1)

    @pl.when(j == 0)
    def _():
        acc_ref[...] = jnp.zeros_like(acc_ref)

    for g in range(hg):
        acc_ref[...] += jnp.dot(o_ref[g].astype(jnp.bfloat16),
                                w_ref[g].astype(jnp.bfloat16),
                                preferred_element_type=jnp.float32)

    @pl.when(j == pl.num_programs(1) - 1)
    def _():
        z = acc_ref[...] + b_ref[...] + res_ref[...].astype(jnp.float32)
        mu = jnp.mean(z, axis=-1, keepdims=True)
        c = z - mu
        var = jnp.mean(c * c, axis=-1, keepdims=True)
        out_ref[...] = (c * jax.lax.rsqrt(var + eps) * g_ref[...]
                        + beta_ref[...]).astype(out_ref.dtype)


def fc_add_layernorm(o, w_fc, b_fc, res2d, gamma, beta, *, tm_pref=512, eps=1e-5):
    n_head, m, d_v = o.shape
    d_model = w_fc.shape[2]
    # VMEM-aware row tile: keep (tm, d_model) f32 blocks around ~2 MiB (v7x safe).
    tm_cap = max(8, ((2 << 20) // (4 * d_model)) // 8 * 8)
    tm = _pick_tile(m, min(tm_pref, tm_cap))
    hg = _heads_per_step(n_head, d_v)
    grid = (m // tm, n_head // hg)
    kernel = functools.partial(_fc_add_ln_kernel, hg=hg, eps=eps)
    return pl.pallas_call(
        kernel,
        out_shape=jax.ShapeDtypeStruct((m, d_model), res2d.dtype),
        grid=grid,
        in_specs=[
            pl.BlockSpec((hg, tm, d_v), lambda i, j: (j, i, 0)),
            pl.BlockSpec((hg, d_v, d_model), lambda i, j: (j, 0, 0)),
            pl.BlockSpec((1, d_model), lambda i, j: (0, 0)),
            pl.BlockSpec((tm, d_model), lambda i, j: (i, 0)),
            pl.BlockSpec((1, d_model), lambda i, j: (0, 0)),
            pl.BlockSpec((1, d_model), lambda i, j: (0, 0)),
        ],
        out_specs=pl.BlockSpec((tm, d_model), lambda i, j: (i, 0)),
        scratch_shapes=[pltpu.VMEM((tm, d_model), jnp.float32)],
        compiler_params=pltpu.CompilerParams(
            dimension_semantics=("parallel", "arbitrary")),
    )(o, w_fc, b_fc, res2d, gamma, beta)


# -----------------------------------------------------------------------------
# MultiHeadAttention forward (glue in plain JAX, all compute in Pallas kernels)
# -----------------------------------------------------------------------------
def multi_head_attention(params, q, k, v, n_head, d_k, d_v,
                         mask=None, fuse_qkv=False, return_attn=True):
    sz_b, len_q, d_model = q.shape
    _, len_k, _ = k.shape
    residual = q

    xq = q.reshape(sz_b * len_q, d_model)
    if fuse_qkv:
        # Self-attention fast path: q is the shared source activation.
        qh, kh, vh = project_qkv_heads(
            xq, params["w_qs"], params["w_ks"], params["w_vs"],
            params["b_qs"], params["b_ks"], params["b_vs"])
        len_k_eff = len_q
    else:
        qh = project_heads(xq, params["w_qs"], params["b_qs"])
        kh = project_heads(k.reshape(sz_b * len_k, d_model),
                           params["w_ks"], params["b_ks"])
        vh = project_heads(v.reshape(sz_b * len_k, d_model),
                           params["w_vs"], params["b_vs"])
        len_k_eff = len_k

    temperature = float(d_k) ** 0.5
    if return_attn:
        mask_f = None if mask is None else mask.astype(jnp.float32)
        o, attn = attention_with_probs(qh, kh, vh, sz_b, len_q, len_k_eff,
                                       temperature, mask=mask_f)
    else:
        if mask is not None:
            raise NotImplementedError("mask not supported in the flash path")
        o = flash_attention(qh, kh, vh, sz_b, len_q, len_k_eff, temperature)
        attn = None
    # (attention dropout: identity in eval mode)

    out = fc_add_layernorm(o, params["w_fc"], params["b_fc"],
                           residual.reshape(sz_b * len_q, d_model),
                           params["ln_gamma"], params["ln_beta"])
    return out.reshape(sz_b, len_q, d_model), attn


# -----------------------------------------------------------------------------
# Parameters (PyTorch-equivalent init), reshaped ONCE to head-major kernel layouts.
# -----------------------------------------------------------------------------
def init_params(key, n_head, d_model, d_k, d_v):
    ks = jax.random.split(key, 8)
    std_qk = (2.0 / (d_model + d_k)) ** 0.5
    std_v = (2.0 / (d_model + d_v)) ** 0.5
    std_fc = (2.0 / (n_head * d_v + d_model)) ** 0.5  # xavier_normal
    w_qs = std_qk * jax.random.normal(ks[0], (n_head * d_k, d_model), jnp.float32)
    w_ks = std_qk * jax.random.normal(ks[1], (n_head * d_k, d_model), jnp.float32)
    w_vs = std_v * jax.random.normal(ks[2], (n_head * d_v, d_model), jnp.float32)
    w_fc = std_fc * jax.random.normal(ks[3], (d_model, n_head * d_v), jnp.float32)
    bnd = 1.0 / float(d_model) ** 0.5
    b_qs = jax.random.uniform(ks[4], (n_head * d_k,), jnp.float32, -bnd, bnd)
    b_ks = jax.random.uniform(ks[5], (n_head * d_k,), jnp.float32, -bnd, bnd)
    b_vs = jax.random.uniform(ks[6], (n_head * d_v,), jnp.float32, -bnd, bnd)
    bnd_fc = 1.0 / float(n_head * d_v) ** 0.5
    b_fc = jax.random.uniform(ks[7], (d_model,), jnp.float32, -bnd_fc, bnd_fc)

    def head_major_w(w, d_head):       # (H*d, d_model) -> (H, d_model, d)
        return jnp.transpose(w.reshape(n_head, d_head, d_model), (0, 2, 1))

    return {
        "w_qs": head_major_w(w_qs, d_k), "b_qs": b_qs.reshape(n_head, 1, d_k),
        "w_ks": head_major_w(w_ks, d_k), "b_ks": b_ks.reshape(n_head, 1, d_k),
        "w_vs": head_major_w(w_vs, d_v), "b_vs": b_vs.reshape(n_head, 1, d_v),
        "w_fc": jnp.transpose(w_fc, (1, 0)).reshape(n_head, d_v, d_model),
        "b_fc": b_fc.reshape(1, d_model),
        "ln_gamma": jnp.ones((1, d_model), jnp.float32),
        "ln_beta": jnp.zeros((1, d_model), jnp.float32),
    }


# -----------------------------------------------------------------------------
# Pure-JAX f32 reference (same math as the PyTorch module) for validation.
# -----------------------------------------------------------------------------
def reference_forward(params, q, k, v, n_head, d_k, d_v, mask=None):
    sz_b, len_q, d_model = q.shape
    _, len_k, _ = k.shape

    def proj(x, w, b):
        return jnp.einsum("bld,hdk->hblk", x, w) + b[:, None, :, :]

    qh = proj(q, params["w_qs"], params["b_qs"])
    kh = proj(k, params["w_ks"], params["b_ks"])
    vh = proj(v, params["w_vs"], params["b_vs"])
    s = jnp.einsum("hbqd,hbkd->hbqk", qh, kh) / (float(d_k) ** 0.5)
    if mask is not None:
        s = jnp.where(mask[None, :, :, :], -jnp.inf, s)
    p = jax.nn.softmax(s, axis=-1)
    o = jnp.einsum("hbqk,hbkd->hbqd", p, vh)
    y = jnp.einsum("hbqd,hdm->bqm", o, params["w_fc"]) + params["b_fc"][0]
    z = y + q
    mu = jnp.mean(z, axis=-1, keepdims=True)
    var = jnp.mean((z - mu) ** 2, axis=-1, keepdims=True)
    out = ((z - mu) * jax.lax.rsqrt(var + 1e-5) * params["ln_gamma"][0]
           + params["ln_beta"][0])
    attn = p.reshape(n_head * sz_b, len_q, len_k)
    return out, attn


if __name__ == "__main__":
    n_head, d_model, d_k, d_v = 4, 32, 8, 8
    sz_b, seq_len = 2, 8

    root = jax.random.PRNGKey(0)
    kparam, kq, kk, kv = jax.random.split(root, 4)
    params = init_params(kparam, n_head, d_model, d_k, d_v)

    q = jax.random.normal(kq, (sz_b, seq_len, d_model), jnp.float32)
    k = jax.random.normal(kk, (sz_b, seq_len, d_model), jnp.float32)
    v = jax.random.normal(kv, (sz_b, seq_len, d_model), jnp.float32)

    # 1) cross-attention, probabilities returned (PyTorch-parity path)
    mha = jax.jit(functools.partial(
        multi_head_attention, n_head=n_head, d_k=d_k, d_v=d_v))
    out, attn = mha(params, q, k, v)
    jax.block_until_ready((out, attn))
    out_r, attn_r = reference_forward(params, q, k, v, n_head, d_k, d_v)
    assert out.shape == (sz_b, seq_len, d_model)
    assert attn.shape == (n_head * sz_b, seq_len, seq_len)
    assert jnp.max(jnp.abs(out - out_r)) < 1.5e-1   # bf16 MXU operands
    assert jnp.max(jnp.abs(attn - attn_r)) < 5e-2

    # 2) fused-QKV self-attention with a causal mask
    causal = (jnp.arange(seq_len)[None, :] > jnp.arange(seq_len)[:, None])
    mask = jnp.broadcast_to(causal, (sz_b, seq_len, seq_len))
    mha_self = jax.jit(functools.partial(
        multi_head_attention, n_head=n_head, d_k=d_k, d_v=d_v, fuse_qkv=True))
    out_s, attn_s = mha_self(params, q, q, q, mask=mask)
    jax.block_until_ready((out_s, attn_s))
    out_sr, attn_sr = reference_forward(params, q, q, q, n_head, d_k, d_v, mask=mask)
    assert jnp.max(jnp.abs(out_s - out_sr)) < 1.5e-1
    assert jnp.max(jnp.abs(attn_s - attn_sr)) < 5e-2

    # 3) flash path (online softmax over Lk, no probability output)
    mha_flash = jax.jit(functools.partial(
        multi_head_attention, n_head=n_head, d_k=d_k, d_v=d_v, return_attn=False))
    out_f, attn_f = mha_flash(params, q, k, v)
    jax.block_until_ready(out_f)
    assert attn_f is None
    assert jnp.max(jnp.abs(out_f - out_r)) < 1.5e-1

    print("KERNEL_OK")
</pallas_src>

<mosaic_0001>
module attributes {stable_mosaic.version = 11 : i64} {
  func.func @_attn_probs_kernel(%arg0: i32, %arg1: i32, %arg2: i32, %arg3: memref<1x8x8xf32, #tpu.memory_space<vmem>>, %arg4: memref<1x8x8xf32, #tpu.memory_space<vmem>>, %arg5: memref<1x8x8xf32, #tpu.memory_space<vmem>>, %arg6: memref<1x8x8xf32, #tpu.memory_space<vmem>>, %arg7: memref<1x8x8xf32, #tpu.memory_space<vmem>>) attributes {dimension_semantics = [#tpu.dimension_semantics<parallel>, #tpu.dimension_semantics<parallel>, #tpu.dimension_semantics<parallel>], iteration_bounds = array<i64: 4, 2, 1>, scalar_prefetch = 0 : i64, scratch_operands = 0 : i64, tpu.core_type = #tpu.core_type<tc>, window_params = [{transform_indices = @transform_0, window_bounds = array<i64: 1, 8, 8>}, {transform_indices = @transform_1, window_bounds = array<i64: 1, 8, 8>}, {transform_indices = @transform_2, window_bounds = array<i64: 1, 8, 8>}, {transform_indices = @transform_3, window_bounds = array<i64: 1, 8, 8>}, {transform_indices = @transform_4, window_bounds = array<i64: 1, 8, 8>}]} {
    %c0 = arith.constant 0 : index
    %c0_0 = arith.constant 0 : index
    %c0_1 = arith.constant 0 : index
    %0 = vector.load %arg3[%c0, %c0_0, %c0_1] : memref<1x8x8xf32, #tpu.memory_space<vmem>>, vector<1x8x8xf32>
    %1 = vector.shape_cast %0 : vector<1x8x8xf32> to vector<8x8xf32>
    %2 = arith.truncf %1 : vector<8x8xf32> to vector<8x8xbf16>
    %c0_2 = arith.constant 0 : index
    %c0_3 = arith.constant 0 : index
    %c0_4 = arith.constant 0 : index
    %3 = vector.load %arg4[%c0_2, %c0_3, %c0_4] : memref<1x8x8xf32, #tpu.memory_space<vmem>>, vector<1x8x8xf32>
    %4 = vector.shape_cast %3 : vector<1x8x8xf32> to vector<8x8xf32>
    %5 = arith.truncf %4 : vector<8x8xf32> to vector<8x8xbf16>
    %cst = arith.constant dense<0.000000e+00> : vector<8x8xf32>
    %6 = tpu.matmul %2, %5, %cst {dimension_numbers = #tpu.dot_dimension_numbers<[1], [1], [0], [0], [0, 0, 1, 0], [], []>} : vector<8x8xbf16>, vector<8x8xbf16>, vector<8x8xf32> -> vector<8x8xf32>
    %cst_5 = arith.constant 0.353553385 : f32
    %7 = vector.broadcast %cst_5 : f32 to vector<8x8xf32>
    %8 = arith.mulf %6, %7 : vector<8x8xf32>
    %cst_6 = arith.constant dense<0xFF800000> : vector<8xf32>
    %9 = vector.multi_reduction <maximumf>, %8, %cst_6 [1] : vector<8x8xf32> to vector<8xf32>
    %10 = vector.shape_cast %9 : vector<8xf32> to vector<8x1xf32>
    %11 = vector.broadcast %10 : vector<8x1xf32> to vector<8x8xf32>
    %12 = arith.subf %8, %11 : vector<8x8xf32>
    %13 = math.exp %12 : vector<8x8xf32>
    %cst_7 = arith.constant dense<0.000000e+00> : vector<8xf32>
    %14 = vector.multi_reduction <add>, %13, %cst_7 [1] : vector<8x8xf32> to vector<8xf32>
    %15 = vector.shape_cast %14 : vector<8xf32> to vector<8x1xf32>
    %16 = vector.broadcast %15 : vector<8x1xf32> to vector<8x8xf32>
    %17 = arith.divf %13, %16 : vector<8x8xf32>
    %c0_8 = arith.constant 0 : index
    %c0_9 = arith.constant 0 : index
    %c0_10 = arith.constant 0 : index
    %18 = vector.load %arg7[%c0_8, %c0_9, %c0_10] : memref<1x8x8xf32, #tpu.memory_space<vmem>>, vector<1x8x8xf32>
    %19 = vector.shape_cast %18 : vector<1x8x8xf32> to vector<8x8xf32>
    %20 = vector.shape_cast %17 : vector<8x8xf32> to vector<1x8x8xf32>
    tpu.vector_store %arg7[%c0_8, %c0_9, %c0_10], %20 {strides = array<i32>} : memref<1x8x8xf32, #tpu.memory_space<vmem>>, vector<1x8x8xf32>,
    %21 = arith.truncf %17 : vector<8x8xf32> to vector<8x8xbf16>
    %c0_11 = arith.constant 0 : index
    %c0_12 = arith.constant 0 : index
    %c0_13 = arith.constant 0 : index
    %22 = vector.load %arg5[%c0_11, %c0_12, %c0_13] : memref<1x8x8xf32, #tpu.memory_space<vmem>>, vector<1x8x8xf32>
    %23 = vector.shape_cast %22 : vector<1x8x8xf32> to vector<8x8xf32>
    %24 = arith.truncf %23 : vector<8x8xf32> to vector<8x8xbf16>
    %cst_14 = arith.constant dense<0.000000e+00> : vector<8x8xf32>
    %25 = tpu.matmul %21, %24, %cst_14 {dimension_numbers = #tpu.dot_dimension_numbers<[1], [0], [0], [1], [0, 0, 1, 1], [], []>} : vector<8x8xbf16>, vector<8x8xbf16>, vector<8x8xf32> -> vector<8x8xf32>
    %c0_15 = arith.constant 0 : index
    %c0_16 = arith.constant 0 : index
    %c0_17 = arith.constant 0 : index
    %26 = vector.load %arg6[%c0_15, %c0_16, %c0_17] : memref<1x8x8xf32, #tpu.memory_space<vmem>>, vector<1x8x8xf32>
    %27 = vector.shape_cast %26 : vector<1x8x8xf32> to vector<8x8xf32>
    %28 = vector.shape_cast %25 : vector<8x8xf32> to vector<1x8x8xf32>
    tpu.vector_store %arg6[%c0_15, %c0_16, %c0_17], %28 {strides = array<i32>} : memref<1x8x8xf32, #tpu.memory_space<vmem>>, vector<1x8x8xf32>,
    return
  }
  func.func @transform_0(%arg0: i32, %arg1: i32, %arg2: i32) -> (i32, i32, i32) {
    %c1_i32 = arith.constant 1 : i32
    %0 = arith.muli %arg1, %c1_i32 : i32
    %1 = arith.addi %0, %arg2 : i32
    %c0_i32 = arith.constant 0 : i32
    %c0_i32_0 = arith.constant 0 : i32
    return %arg0, %1, %c0_i32 : i32, i32, i32
  }
  func.func @transform_1(%arg0: i32, %arg1: i32, %arg2: i32) -> (i32, i32, i32) {
    %c0_i32 = arith.constant 0 : i32
    %c0_i32_0 = arith.constant 0 : i32
    return %arg0, %arg1, %c0_i32 : i32, i32, i32
  }
  func.func @transform_2(%arg0: i32, %arg1: i32, %arg2: i32) -> (i32, i32, i32) {
    %c0_i32 = arith.constant 0 : i32
    %c0_i32_0 = arith.constant 0 : i32
    return %arg0, %arg1, %c0_i32 : i32, i32, i32
  }
  func.func @transform_3(%arg0: i32, %arg1: i32, %arg2: i32) -> (i32, i32, i32) {
    %c1_i32 = arith.constant 1 : i32
    %0 = arith.muli %arg1, %c1_i32 : i32
    %1 = arith.addi %0, %arg2 : i32
    %c0_i32 = arith.constant 0 : i32
    %c0_i32_0 = arith.constant 0 : i32
    return %arg0, %1, %c0_i32 : i32, i32, i32
  }
  func.func @transform_4(%arg0: i32, %arg1: i32, %arg2: i32) -> (i32, i32, i32) {
    %c2_i32 = arith.constant 2 : i32
    %0 = arith.muli %arg0, %c2_i32 : i32
    %1 = arith.addi %0, %arg1 : i32
    %c0_i32 = arith.constant 0 : i32
    %c0_i32_0 = arith.constant 0 : i32
    return %1, %arg2, %c0_i32 : i32, i32, i32
  }
}

module attributes {stable_mosaic.version = 11 : i64} {
  func.func @_proj_kernel(%arg0: i32, %arg1: i32, %arg2: i32, %arg3: memref<16x32xf32, #tpu.memory_space<vmem>>, %arg4: memref<4x32x8xf32, #tpu.memory_space<vmem>>, %arg5: memref<4x1x8xf32, #tpu.memory_space<vmem>>, %arg6: memref<4x16x8xf32, #tpu.memory_space<vmem>>, %arg7: memref<4x16x8xf32, #tpu.memory_space<vmem>>) attributes {dimension_semantics = [#tpu.dimension_semantics<parallel>, #tpu.dimension_semantics<parallel>, #tpu.dimension_semantics<arbitrary>], iteration_bounds = array<i64: 1, 1, 1>, scalar_prefetch = 0 : i64, scratch_operands = 1 : i64, tpu.core_type = #tpu.core_type<tc>, window_params = [{transform_indices = @transform_0, window_bounds = array<i64: 16, 32>}, {transform_indices = @transform_1, window_bounds = array<i64: 4, 32, 8>}, {transform_indices = @transform_2, window_bounds = array<i64: 4, 1, 8>}, {transform_indices = @transform_3, window_bounds = array<i64: 4, 16, 8>}]} {
    %c0_i32 = arith.constant 0 : i32
    %0 = arith.cmpi eq, %arg2, %c0_i32 : i32
    %1 = arith.extui %0 : i1 to i32
    %c0_i32_0 = arith.constant 0 : i32
    %2 = arith.cmpi ne, %1, %c0_i32_0 : i32
    scf.if %2 {
      %cst_40 = arith.constant 0.000000e+00 : f32
      %48 = vector.broadcast %cst_40 : f32 to vector<4x16x8xf32>
      %c0_41 = arith.constant 0 : index
      %c0_42 = arith.constant 0 : index
      %c0_43 = arith.constant 0 : index
      %49 = vector.load %arg7[%c0_41, %c0_42, %c0_43] : memref<4x16x8xf32, #tpu.memory_space<vmem>>, vector<4x16x8xf32>
      tpu.vector_store %arg7[%c0_41, %c0_42, %c0_43], %48 {strides = array<i32>} : memref<4x16x8xf32, #tpu.memory_space<vmem>>, vector<4x16x8xf32>,
    } else {
    }
    %c0 = arith.constant 0 : index
    %c0_1 = arith.constant 0 : index
    %3 = vector.load %arg3[%c0, %c0_1] : memref<16x32xf32, #tpu.memory_space<vmem>>, vector<16x32xf32>
    %4 = arith.truncf %3 : vector<16x32xf32> to vector<16x32xbf16>
    %c0_2 = arith.constant 0 : index
    %c0_3 = arith.constant 0 : index
    %c0_4 = arith.constant 0 : index
    %5 = vector.load %arg7[%c0_2, %c0_3, %c0_4] : memref<4x16x8xf32, #tpu.memory_space<vmem>>, vector<1x16x8xf32>
    %6 = vector.shape_cast %5 : vector<1x16x8xf32> to vector<16x8xf32>
    %c0_5 = arith.constant 0 : index
    %c0_6 = arith.constant 0 : index
    %c0_7 = arith.constant 0 : index
    %7 = vector.load %arg4[%c0_5, %c0_6, %c0_7] : memref<4x32x8xf32, #tpu.memory_space<vmem>>, vector<1x32x8xf32>
    %8 = vector.shape_cast %7 : vector<1x32x8xf32> to vector<32x8xf32>
    %9 = arith.truncf %8 : vector<32x8xf32> to vector<32x8xbf16>
    %cst = arith.constant dense<0.000000e+00> : vector<16x8xf32>
    %10 = tpu.matmul %4, %9, %cst {dimension_numbers = #tpu.dot_dimension_numbers<[1], [0], [0], [1], [0, 0, 1, 1], [], []>} : vector<16x32xbf16>, vector<32x8xbf16>, vector<16x8xf32> -> vector<16x8xf32>
    %11 = arith.addf %6, %10 : vector<16x8xf32>
    %c0_8 = arith.constant 0 : index
    %c0_9 = arith.constant 0 : index
    %c0_10 = arith.constant 0 : index
    %12 = vector.load %arg7[%c0_8, %c0_9, %c0_10] : memref<4x16x8xf32, #tpu.memory_space<vmem>>, vector<1x16x8xf32>
    %13 = vector.shape_cast %12 : vector<1x16x8xf32> to vector<16x8xf32>
    %14 = vector.shape_cast %11 : vector<16x8xf32> to vector<1x16x8xf32>
    tpu.vector_store %arg7[%c0_8, %c0_9, %c0_10], %14 {strides = array<i32>} : memref<4x16x8xf32, #tpu.memory_space<vmem>>, vector<1x16x8xf32>,
    %c1 = arith.constant 1 : index
    %c0_11 = arith.constant 0 : index
    %c0_12 = arith.constant 0 : index
    %15 = vector.load %arg7[%c1, %c0_11, %c0_12] : memref<4x16x8xf32, #tpu.memory_space<vmem>>, vector<1x16x8xf32>
    %16 = vector.shape_cast %15 : vector<1x16x8xf32> to vector<16x8xf32>
    %c1_13 = arith.constant 1 : index
    %c0_14 = arith.constant 0 : index
    %c0_15 = arith.constant 0 : index
    %17 = vector.load %arg4[%c1_13, %c0_14, %c0_15] : memref<4x32x8xf32, #tpu.memory_space<vmem>>, vector<1x32x8xf32>
    %18 = vector.shape_cast %17 : vector<1x32x8xf32> to vector<32x8xf32>
    %19 = arith.truncf %18 : vector<32x8xf32> to vector<32x8xbf16>
    %cst_16 = arith.constant dense<0.000000e+00> : vector<16x8xf32>
    %20 = tpu.matmul %4, %19, %cst_16 {dimension_numbers = #tpu.dot_dimension_numbers<[1], [0], [0], [1], [0, 0, 1, 1], [], []>} : vector<16x32xbf16>, vector<32x8xbf16>, vector<16x8xf32> -> vector<16x8xf32>
    %21 = arith.addf %16, %20 : vector<16x8xf32>
    %c1_17 = arith.constant 1 : index
    %c0_18 = arith.constant 0 : index
    %c0_19 = arith.constant 0 : index
    %22 = vector.load %arg7[%c1_17, %c0_18, %c0_19] : memref<4x16x8xf32, #tpu.memory_space<vmem>>, vector<1x16x8xf32>
    %23 = vector.shape_cast %22 : vector<1x16x8xf32> to vector<16x8xf32>
    %24 = vector.shape_cast %21 : vector<16x8xf32> to vector<1x16x8xf32>
    tpu.vector_store %arg7[%c1_17, %c0_18, %c0_19], %24 {strides = array<i32>} : memref<4x16x8xf32, #tpu.memory_space<vmem>>, vector<1x16x8xf32>,
    %c2 = arith.constant 2 : index
    %c0_20 = arith.constant 0 : index
    %c0_21 = arith.constant 0 : index
    %25 = vector.load %arg7[%c2, %c0_20, %c0_21] : memref<4x16x8xf32, #tpu.memory_space<vmem>>, vector<1x16x8xf32>
    %26 = vector.shape_cast %25 : vector<1x16x8xf32> to vector<16x8xf32>
    %c2_22 = arith.constant 2 : index
    %c0_23 = arith.constant 0 : index
    %c0_24 = arith.constant 0 : index
    %27 = vector.load %arg4[%c2_22, %c0_23, %c0_24] : memref<4x32x8xf32, #tpu.memory_space<vmem>>, vector<1x32x8xf32>
    %28 = vector.shape_cast %27 : vector<1x32x8xf32> to vector<32x8xf32>
    %29 = arith.truncf %28 : vector<32x8xf32> to vector<32x8xbf16>
    %cst_25 = arith.constant dense<0.000000e+00> : vector<16x8xf32>
    %30 = tpu.matmul %4, %29, %cst_25 {dimension_numbers = #tpu.dot_dimension_numbers<[1], [0], [0], [1], [0, 0, 1, 1], [], []>} : vector<16x32xbf16>, vector<32x8xbf16>, vector<16x8xf32> -> vector<16x8xf32>
    %31 = arith.addf %26, %30 : vector<16x8xf32>
    %c2_26 = arith.constant 2 : index
    %c0_27 = arith.constant 0 : index
    %c0_28 = arith.constant 0 : index
    %32 = vector.load %arg7[%c2_26, %c0_27, %c0_28] : memref<4x16x8xf32, #tpu.memory_space<vmem>>, vector<1x16x8xf32>
    %33 = vector.shape_cast %32 : vector<1x16x8xf32> to vector<16x8xf32>
    %34 = vector.shape_cast %31 : vector<16x8xf32> to vector<1x16x8xf32>
    tpu.vector_store %arg7[%c2_26, %c0_27, %c0_28], %34 {strides = array<i32>} : memref<4x16x8xf32, #tpu.memory_space<vmem>>, vector<1x16x8xf32>,
    %c3 = arith.constant 3 : index
    %c0_29 = arith.constant 0 : index
    %c0_30 = arith.constant 0 : index
    %35 = vector.load %arg7[%c3, %c0_29, %c0_30] : memref<4x16x8xf32, #tpu.memory_space<vmem>>, vector<1x16x8xf32>
    %36 = vector.shape_cast %35 : vector<1x16x8xf32> to vector<16x8xf32>
    %c3_31 = arith.constant 3 : index
    %c0_32 = arith.constant 0 : index
    %c0_33 = arith.constant 0 : index
    %37 = vector.load %arg4[%c3_31, %c0_32, %c0_33] : memref<4x32x8xf32, #tpu.memory_space<vmem>>, vector<1x32x8xf32>
    %38 = vector.shape_cast %37 : vector<1x32x8xf32> to vector<32x8xf32>
    %39 = arith.truncf %38 : vector<32x8xf32> to vector<32x8xbf16>
    %cst_34 = arith.constant dense<0.000000e+00> : vector<16x8xf32>
    %40 = tpu.matmul %4, %39, %cst_34 {dimension_numbers = #tpu.dot_dimension_numbers<[1], [0], [0], [1], [0, 0, 1, 1], [], []>} : vector<16x32xbf16>, vector<32x8xbf16>, vector<16x8xf32> -> vector<16x8xf32>
    %41 = arith.addf %36, %40 : vector<16x8xf32>
    %c3_35 = arith.constant 3 : index
    %c0_36 = arith.constant 0 : index
    %c0_37 = arith.constant 0 : index
    %42 = vector.load %arg7[%c3_35, %c0_36, %c0_37] : memref<4x16x8xf32, #tpu.memory_space<vmem>>, vector<1x16x8xf32>
    %43 = vector.shape_cast %42 : vector<1x16x8xf32> to vector<16x8xf32>
    %44 = vector.shape_cast %41 : vector<16x8xf32> to vector<1x16x8xf32>
    tpu.vector_store %arg7[%c3_35, %c0_36, %c0_37], %44 {strides = array<i32>} : memref<4x16x8xf32, #tpu.memory_space<vmem>>, vector<1x16x8xf32>,
    %c0_i32_38 = arith.constant 0 : i32
    %45 = arith.cmpi eq, %arg2, %c0_i32_38 : i32
    %46 = arith.extui %45 : i1 to i32
    %c0_i32_39 = arith.constant 0 : i32
    %47 = arith.cmpi ne, %46, %c0_i32_39 : i32
    scf.if %47 {
      %c0_40 = arith.constant 0 : index
      %c0_41 = arith.constant 0 : index
      %c0_42 = arith.constant 0 : index
      %48 = vector.load %arg7[%c0_40, %c0_41, %c0_42] : memref<4x16x8xf32, #tpu.memory_space<vmem>>, vector<4x16x8xf32>
      %c0_43 = arith.constant 0 : index
      %c0_44 = arith.constant 0 : index
      %c0_45 = arith.constant 0 : index
      %49 = vector.load %arg5[%c0_43, %c0_44, %c0_45] : memref<4x1x8xf32, #tpu.memory_space<vmem>>, vector<4x1x8xf32>
      %50 = vector.broadcast %49 : vector<4x1x8xf32> to vector<4x16x8xf32>
      %51 = arith.addf %48, %50 : vector<4x16x8xf32>
      %c0_46 = arith.constant 0 : index
      %c0_47 = arith.constant 0 : index
      %c0_48 = arith.constant 0 : index
      %52 = vector.load %arg6[%c0_46, %c0_47, %c0_48] : memref<4x16x8xf32, #tpu.memory_space<vmem>>, vector<4x16x8xf32>
      tpu.vector_store %arg6[%c0_46, %c0_47, %c0_48], %51 {strides = array<i32>} : memref<4x16x8xf32, #tpu.memory_space<vmem>>, vector<4x16x8xf32>,
    } else {
    }
    return
  }
  func.func @transform_0(%arg0: i32, %arg1: i32, %arg2: i32) -> (i32, i32) {
    %c0_i32 = arith.constant 0 : i32
    return %arg0, %arg2 : i32, i32
  }
  func.func @transform_1(%arg0: i32, %arg1: i32, %arg2: i32) -> (i32, i32, i32) {
    %c0_i32 = arith.constant 0 : i32
    %c0_i32_0 = arith.constant 0 : i32
    return %arg1, %arg2, %c0_i32 : i32, i32, i32
  }
  func.func @transform_2(%arg0: i32, %arg1: i32, %arg2: i32) -> (i32, i32, i32) {
    %c0_i32 = arith.constant 0 : i32
    %c0_i32_0 = arith.constant 0 : i32
    %c0_i32_1 = arith.constant 0 : i32
    return %arg1, %c0_i32, %c0_i32_0 : i32, i32, i32
  }
  func.func @transform_3(%arg0: i32, %arg1: i32, %arg2: i32) -> (i32, i32, i32) {
    %c0_i32 = arith.constant 0 : i32
    %c0_i32_0 = arith.constant 0 : i32
    return %arg1, %arg0, %c0_i32 : i32, i32, i32
  }
}

module attributes {stable_mosaic.version = 11 : i64} {
  func.func @_fc_add_ln_kernel(%arg0: i32, %arg1: i32, %arg2: memref<4x16x8xf32, #tpu.memory_space<vmem>>, %arg3: memref<4x8x32xf32, #tpu.memory_space<vmem>>, %arg4: memref<1x32xf32, #tpu.memory_space<vmem>>, %arg5: memref<16x32xf32, #tpu.memory_space<vmem>>, %arg6: memref<1x32xf32, #tpu.memory_space<vmem>>, %arg7: memref<1x32xf32, #tpu.memory_space<vmem>>, %arg8: memref<16x32xf32, #tpu.memory_space<vmem>>, %arg9: memref<16x32xf32, #tpu.memory_space<vmem>>) attributes {dimension_semantics = [#tpu.dimension_semantics<parallel>, #tpu.dimension_semantics<arbitrary>], iteration_bounds = array<i64: 1, 1>, scalar_prefetch = 0 : i64, scratch_operands = 1 : i64, tpu.core_type = #tpu.core_type<tc>, window_params = [{transform_indices = @transform_0, window_bounds = array<i64: 4, 16, 8>}, {transform_indices = @transform_1, window_bounds = array<i64: 4, 8, 32>}, {pipeline_mode = #tpu.pipeline_mode<synchronous>, transform_indices = @transform_2, window_bounds = array<i64: 1, 32>}, {transform_indices = @transform_3, window_bounds = array<i64: 16, 32>}, {pipeline_mode = #tpu.pipeline_mode<synchronous>, transform_indices = @transform_4, window_bounds = array<i64: 1, 32>}, {pipeline_mode = #tpu.pipeline_mode<synchronous>, transform_indices = @transform_5, window_bounds = array<i64: 1, 32>}, {transform_indices = @transform_6, window_bounds = array<i64: 16, 32>}]} {
    %c0_i32 = arith.constant 0 : i32
    %0 = arith.cmpi eq, %arg1, %c0_i32 : i32
    %1 = arith.extui %0 : i1 to i32
    %c0_i32_0 = arith.constant 0 : i32
    %2 = arith.cmpi ne, %1, %c0_i32_0 : i32
    scf.if %2 {
      %cst_42 = arith.constant 0.000000e+00 : f32
      %46 = vector.broadcast %cst_42 : f32 to vector<16x32xf32>
      %c0_43 = arith.constant 0 : index
      %c0_44 = arith.constant 0 : index
      %47 = vector.load %arg9[%c0_43, %c0_44] : memref<16x32xf32, #tpu.memory_space<vmem>>, vector<16x32xf32>
      tpu.vector_store %arg9[%c0_43, %c0_44], %46 {strides = array<i32>} : memref<16x32xf32, #tpu.memory_space<vmem>>, vector<16x32xf32>,
    } else {
    }
    %c0 = arith.constant 0 : index
    %c0_1 = arith.constant 0 : index
    %3 = vector.load %arg9[%c0, %c0_1] : memref<16x32xf32, #tpu.memory_space<vmem>>, vector<16x32xf32>
    %c0_2 = arith.constant 0 : index
    %c0_3 = arith.constant 0 : index
    %c0_4 = arith.constant 0 : index
    %4 = vector.load %arg2[%c0_2, %c0_3, %c0_4] : memref<4x16x8xf32, #tpu.memory_space<vmem>>, vector<1x16x8xf32>
    %5 = vector.shape_cast %4 : vector<1x16x8xf32> to vector<16x8xf32>
    %6 = arith.truncf %5 : vector<16x8xf32> to vector<16x8xbf16>
    %c0_5 = arith.constant 0 : index
    %c0_6 = arith.constant 0 : index
    %c0_7 = arith.constant 0 : index
    %7 = vector.load %arg3[%c0_5, %c0_6, %c0_7] : memref<4x8x32xf32, #tpu.memory_space<vmem>>, vector<1x8x32xf32>
    %8 = vector.shape_cast %7 : vector<1x8x32xf32> to vector<8x32xf32>
    %9 = arith.truncf %8 : vector<8x32xf32> to vector<8x32xbf16>
    %cst = arith.constant dense<0.000000e+00> : vector<16x32xf32>
    %10 = tpu.matmul %6, %9, %cst {dimension_numbers = #tpu.dot_dimension_numbers<[1], [0], [0], [1], [0, 0, 1, 1], [], []>} : vector<16x8xbf16>, vector<8x32xbf16>, vector<16x32xf32> -> vector<16x32xf32>
    %11 = arith.addf %3, %10 : vector<16x32xf32>
    %c0_8 = arith.constant 0 : index
    %c0_9 = arith.constant 0 : index
    %12 = vector.load %arg9[%c0_8, %c0_9] : memref<16x32xf32, #tpu.memory_space<vmem>>, vector<16x32xf32>
    tpu.vector_store %arg9[%c0_8, %c0_9], %11 {strides = array<i32>} : memref<16x32xf32, #tpu.memory_space<vmem>>, vector<16x32xf32>,
    %c0_10 = arith.constant 0 : index
    %c0_11 = arith.constant 0 : index
    %13 = vector.load %arg9[%c0_10, %c0_11] : memref<16x32xf32, #tpu.memory_space<vmem>>, vector<16x32xf32>
    %c1 = arith.constant 1 : index
    %c0_12 = arith.constant 0 : index
    %c0_13 = arith.constant 0 : index
    %14 = vector.load %arg2[%c1, %c0_12, %c0_13] : memref<4x16x8xf32, #tpu.memory_space<vmem>>, vector<1x16x8xf32>
    %15 = vector.shape_cast %14 : vector<1x16x8xf32> to vector<16x8xf32>
    %16 = arith.truncf %15 : vector<16x8xf32> to vector<16x8xbf16>
    %c1_14 = arith.constant 1 : index
    %c0_15 = arith.constant 0 : index
    %c0_16 = arith.constant 0 : index
    %17 = vector.load %arg3[%c1_14, %c0_15, %c0_16] : memref<4x8x32xf32, #tpu.memory_space<vmem>>, vector<1x8x32xf32>
    %18 = vector.shape_cast %17 : vector<1x8x32xf32> to vector<8x32xf32>
    %19 = arith.truncf %18 : vector<8x32xf32> to vector<8x32xbf16>
    %cst_17 = arith.constant dense<0.000000e+00> : vector<16x32xf32>
    %20 = tpu.matmul %16, %19, %cst_17 {dimension_numbers = #tpu.dot_dimension_numbers<[1], [0], [0], [1], [0, 0, 1, 1], [], []>} : vector<16x8xbf16>, vector<8x32xbf16>, vector<16x32xf32> -> vector<16x32xf32>
    %21 = arith.addf %13, %20 : vector<16x32xf32>
    %c0_18 = arith.constant 0 : index
    %c0_19 = arith.constant 0 : index
    %22 = vector.load %arg9[%c0_18, %c0_19] : memref<16x32xf32, #tpu.memory_space<vmem>>, vector<16x32xf32>
    tpu.vector_store %arg9[%c0_18, %c0_19], %21 {strides = array<i32>} : memref<16x32xf32, #tpu.memory_space<vmem>>, vector<16x32xf32>,
    %c0_20 = arith.constant 0 : index
    %c0_21 = arith.constant 0 : index
    %23 = vector.load %arg9[%c0_20, %c0_21] : memref<16x32xf32, #tpu.memory_space<vmem>>, vector<16x32xf32>
    %c2 = arith.constant 2 : index
    %c0_22 = arith.constant 0 : index
    %c0_23 = arith.constant 0 : index
    %24 = vector.load %arg2[%c2, %c0_22, %c0_23] : memref<4x16x8xf32, #tpu.memory_space<vmem>>, vector<1x16x8xf32>
    %25 = vector.shape_cast %24 : vector<1x16x8xf32> to vector<16x8xf32>
    %26 = arith.truncf %25 : vector<16x8xf32> to vector<16x8xbf16>
    %c2_24 = arith.constant 2 : index
    %c0_25 = arith.constant 0 : index
    %c0_26 = arith.constant 0 : index
    %27 = vector.load %arg3[%c2_24, %c0_25, %c0_26] : memref<4x8x32xf32, #tpu.memory_space<vmem>>, vector<1x8x32xf32>
    %28 = vector.shape_cast %27 : vector<1x8x32xf32> to vector<8x32xf32>
    %29 = arith.truncf %28 : vector<8x32xf32> to vector<8x32xbf16>
    %cst_27 = arith.constant dense<0.000000e+00> : vector<16x32xf32>
    %30 = tpu.matmul %26, %29, %cst_27 {dimension_numbers = #tpu.dot_dimension_numbers<[1], [0], [0], [1], [0, 0, 1, 1], [], []>} : vector<16x8xbf16>, vector<8x32xbf16>, vector<16x32xf32> -> vector<16x32xf32>
    %31 = arith.addf %23, %30 : vector<16x32xf32>
    %c0_28 = arith.constant 0 : index
    %c0_29 = arith.constant 0 : index
    %32 = vector.load %arg9[%c0_28, %c0_29] : memref<16x32xf32, #tpu.memory_space<vmem>>, vector<16x32xf32>
    tpu.vector_store %arg9[%c0_28, %c0_29], %31 {strides = array<i32>} : memref<16x32xf32, #tpu.memory_space<vmem>>, vector<16x32xf32>,
    %c0_30 = arith.constant 0 : index
    %c0_31 = arith.constant 0 : index
    %33 = vector.load %arg9[%c0_30, %c0_31] : memref<16x32xf32, #tpu.memory_space<vmem>>, vector<16x32xf32>
    %c3 = arith.constant 3 : index
    %c0_32 = arith.constant 0 : index
    %c0_33 = arith.constant 0 : index
    %34 = vector.load %arg2[%c3, %c0_32, %c0_33] : memref<4x16x8xf32, #tpu.memory_space<vmem>>, vector<1x16x8xf32>
    %35 = vector.shape_cast %34 : vector<1x16x8xf32> to vector<16x8xf32>
    %36 = arith.truncf %35 : vector<16x8xf32> to vector<16x8xbf16>
    %c3_34 = arith.constant 3 : index
    %c0_35 = arith.constant 0 : index
    %c0_36 = arith.constant 0 : index
    %37 = vector.load %arg3[%c3_34, %c0_35, %c0_36] : memref<4x8x32xf32, #tpu.memory_space<vmem>>, vector<1x8x32xf32>
    %38 = vector.shape_cast %37 : vector<1x8x32xf32> to vector<8x32xf32>
    %39 = arith.truncf %38 : vector<8x32xf32> to vector<8x32xbf16>
    %cst_37 = arith.constant dense<0.000000e+00> : vector<16x32xf32>
    %40 = tpu.matmul %36, %39, %cst_37 {dimension_numbers = #tpu.dot_dimension_numbers<[1], [0], [0], [1], [0, 0, 1, 1], [], []>} : vector<16x8xbf16>, vector<8x32xbf16>, vector<16x32xf32> -> vector<16x32xf32>
    %41 = arith.addf %33, %40 : vector<16x32xf32>
    %c0_38 = arith.constant 0 : index
    %c0_39 = arith.constant 0 : index
    %42 = vector.load %arg9[%c0_38, %c0_39] : memref<16x32xf32, #tpu.memory_space<vmem>>, vector<16x32xf32>
    tpu.vector_store %arg9[%c0_38, %c0_39], %41 {strides = array<i32>} : memref<16x32xf32, #tpu.memory_space<vmem>>, vector<16x32xf32>,
    %c0_i32_40 = arith.constant 0 : i32
    %43 = arith.cmpi eq, %arg1, %c0_i32_40 : i32
    %44 = arith.extui %43 : i1 to i32
    %c0_i32_41 = arith.constant 0 : i32
    %45 = arith.cmpi ne, %44, %c0_i32_41 : i32
    scf.if %45 {
      %c0_42 = arith.constant 0 : index
      %c0_43 = arith.constant 0 : index
      %46 = vector.load %arg9[%c0_42, %c0_43] : memref<16x32xf32, #tpu.memory_space<vmem>>, vector<16x32xf32>
      %c0_44 = arith.constant 0 : index
      %c0_45 = arith.constant 0 : index
      %47 = vector.load %arg4[%c0_44, %c0_45] : memref<1x32xf32, #tpu.memory_space<vmem>>, vector<1x32xf32>
      %48 = vector.broadcast %47 : vector<1x32xf32> to vector<16x32xf32>
      %49 = arith.addf %46, %48 : vector<16x32xf32>
      %c0_46 = arith.constant 0 : index
      %c0_47 = arith.constant 0 : index
      %50 = vector.load %arg5[%c0_46, %c0_47] : memref<16x32xf32, #tpu.memory_space<vmem>>, vector<16x32xf32>
      %51 = arith.addf %49, %50 : vector<16x32xf32>
      %cst_48 = arith.constant dense<0.000000e+00> : vector<16xf32>
      %52 = vector.multi_reduction <add>, %51, %cst_48 [1] : vector<16x32xf32> to vector<16xf32>
      %53 = vector.shape_cast %52 : vector<16xf32> to vector<16x1xf32>
      %cst_49 = arith.constant 3.200000e+01 : f32
      %54 = vector.broadcast %cst_49 : f32 to vector<16x1xf32>
      %55 = arith.divf %53, %54 : vector<16x1xf32>
      %56 = vector.broadcast %55 : vector<16x1xf32> to vector<16x32xf32>
      %57 = arith.subf %51, %56 : vector<16x32xf32>
      %58 = arith.mulf %57, %57 : vector<16x32xf32>
      %cst_50 = arith.constant dense<0.000000e+00> : vector<16xf32>
      %59 = vector.multi_reduction <add>, %58, %cst_50 [1] : vector<16x32xf32> to vector<16xf32>
      %60 = vector.shape_cast %59 : vector<16xf32> to vector<16x1xf32>
      %cst_51 = arith.constant 3.200000e+01 : f32
      %61 = vector.broadcast %cst_51 : f32 to vector<16x1xf32>
      %62 = arith.divf %60, %61 : vector<16x1xf32>
      %cst_52 = arith.constant 9.99999974E-6 : f32
      %63 = vector.broadcast %cst_52 : f32 to vector<16x1xf32>
      %64 = arith.addf %62, %63 : vector<16x1xf32>
      %65 = math.rsqrt %64 : vector<16x1xf32>
      %66 = vector.broadcast %65 : vector<16x1xf32> to vector<16x32xf32>
      %67 = arith.mulf %57, %66 : vector<16x32xf32>
      %c0_53 = arith.constant 0 : index
      %c0_54 = arith.constant 0 : index
      %68 = vector.load %arg6[%c0_53, %c0_54] : memref<1x32xf32, #tpu.memory_space<vmem>>, vector<1x32xf32>
      %69 = vector.broadcast %68 : vector<1x32xf32> to vector<16x32xf32>
      %70 = arith.mulf %67, %69 : vector<16x32xf32>
      %c0_55 = arith.constant 0 : index
      %c0_56 = arith.constant 0 : index
      %71 = vector.load %arg7[%c0_55, %c0_56] : memref<1x32xf32, #tpu.memory_space<vmem>>, vector<1x32xf32>
      %72 = vector.broadcast %71 : vector<1x32xf32> to vector<16x32xf32>
      %73 = arith.addf %70, %72 : vector<16x32xf32>
      %c0_57 = arith.constant 0 : index
      %c0_58 = arith.constant 0 : index
      %74 = vector.load %arg8[%c0_57, %c0_58] : memref<16x32xf32, #tpu.memory_space<vmem>>, vector<16x32xf32>
      tpu.vector_store %arg8[%c0_57, %c0_58], %73 {strides = array<i32>} : memref<16x32xf32, #tpu.memory_space<vmem>>, vector<16x32xf32>,
    } else {
    }
    return
  }
  func.func @transform_0(%arg0: i32, %arg1: i32) -> (i32, i32, i32) {
    %c0_i32 = arith.constant 0 : i32
    %c0_i32_0 = arith.constant 0 : i32
    return %arg1, %arg0, %c0_i32 : i32, i32, i32
  }
  func.func @transform_1(%arg0: i32, %arg1: i32) -> (i32, i32, i32) {
    %c0_i32 = arith.constant 0 : i32
    %c0_i32_0 = arith.constant 0 : i32
    %c0_i32_1 = arith.constant 0 : i32
    return %arg1, %c0_i32, %c0_i32_0 : i32, i32, i32
  }
  func.func @transform_2(%arg0: i32, %arg1: i32) -> (i32, i32) {
    %c0_i32 = arith.constant 0 : i32
    %c0_i32_0 = arith.constant 0 : i32
    %c0_i32_1 = arith.constant 0 : i32
    return %c0_i32, %c0_i32_0 : i32, i32
  }
  func.func @transform_3(%arg0: i32, %arg1: i32) -> (i32, i32) {
    %c0_i32 = arith.constant 0 : i32
    %c0_i32_0 = arith.constant 0 : i32
    return %arg0, %c0_i32 : i32, i32
  }
  func.func @transform_4(%arg0: i32, %arg1: i32) -> (i32, i32) {
    %c0_i32 = arith.constant 0 : i32
    %c0_i32_0 = arith.constant 0 : i32
    %c0_i32_1 = arith.constant 0 : i32
    return %c0_i32, %c0_i32_0 : i32, i32
  }
  func.func @transform_5(%arg0: i32, %arg1: i32) -> (i32, i32) {
    %c0_i32 = arith.constant 0 : i32
    %c0_i32_0 = arith.constant 0 : i32
    %c0_i32_1 = arith.constant 0 : i32
    return %c0_i32, %c0_i32_0 : i32, i32
  }
  func.func @transform_6(%arg0: i32, %arg1: i32) -> (i32, i32) {
    %c0_i32 = arith.constant 0 : i32
    %c0_i32_0 = arith.constant 0 : i32
    return %arg0, %c0_i32 : i32, i32
  }
}

</mosaic_0001>

<bundles_post_ra>
// kernel: multi_head_attention.9
= control target key start
LH: loop header
LB: loop body
LE: loop exit
PB: predicated region body
PF: predicated region fallthrough
CT: control target
= control target key end

     0   :  { %vm43_vm0 = vcmask 1043456   ;;  %v435_v3 = vmov 0.0   ;;  %vm436_vm1 = vmmov 0   ;;  %vm29_vm2 = vcmask 261120   ;;  %s566_s0 = inlined_call_operand.vmem [shape: f32[4,16,8], index: 0, kind: input, shape index: {}]   ;;  %s567_s1 = inlined_call_operand.vmem [shape: f32[4,8,32], index: 1, kind: input, shape index: {}]   ;;  %s568_s2 = inlined_call_operand.vmem [shape: f32[1,32], index: 2, kind: input, shape index: {}]   ;;  %s569_s3 = inlined_call_operand.vmem [shape: f32[16,32], index: 3, kind: input, shape index: {}]   ;;  %s570_s4 = inlined_call_operand.vmem [shape: f32[1,32], index: 4, kind: input, shape index: {}]   ;;  %s571_s5 = inlined_call_operand.vmem [shape: f32[1,32], index: 5, kind: input, shape index: {}]   ;;  %s572_s6 = inlined_call_operand.hbm [shape: f32[16,32], index: 6, kind: output, shape index: {}]  }
   0x1   :  { %v37_v0 = vld [vmem:[%s567_s1] sm:$0xff]  ;;  %v35_v2 = vld [vmem:[%s566_s0 + $0x8] sm:$0xff]  ;;  %378 = vmatprep.subr.bf16.mxu0 %v435_v3  ;;  %380 = vmatprep.mubr.msk.bf16.mxu0 %vm436_vm1, %v435_v3  ;;  %v355_v6 = vld [vmem:[%s566_s0 + $0x10] sm:$0xff]  ;;  %30 = vst.msk [vmem:[#allocation2] sm:$0xff] %vm29_vm2, %v435_v3  ;;  %vm39_vm3 = vcmask 64512  }
   0x2   :  { %v34_v1 = vld [vmem:[%s566_s0] sm:$0xff]  ;;  %v38_v4 = vpack.c.bf16 %v37_v0, %v37_v0  ;;  %v357_v5 = vld [vmem:[%s567_s1 + $0x8] sm:$0xff]  ;;  %v356_v7 = vld [vmem:[%s566_s0 + $0x18] sm:$0xff]  ;;  %384 = vmatprep.subr.bf16.mxu1 %v435_v3  ;;  %386 = vmatprep.mubr.msk.bf16.mxu1 %vm436_vm1, %v435_v3  ;;  %31 = vst.msk [vmem:[#allocation2 + $0x8] sm:$0xff] %vm29_vm2, %v435_v3 }
   0x3   :  { %v101_v8 = vpack.c.bf16 %v357_v5, %v357_v5  ;;  %v361_v9 = vld [vmem:[%s567_s1 + $0x10] sm:$0xff]  ;;  %v36_v11 = vpack.c.bf16 %v35_v2, %v34_v1  ;;  %v365_v13 = vld [vmem:[%s567_s1 + $0x18] sm:$0xff]  ;;  %v98_v15 = vpack.c.bf16 %v356_v7, %v355_v6 }
   0x4   :  { %v45_v10 = vsel %vm43_vm0, %v38_v4, 0  ;;  %v161_v12 = vpack.c.bf16 %v361_v9, %v361_v9  ;;  %v221_v16 = vpack.c.bf16 %v365_v13, %v365_v13 }
   0x5   :  { %379 = vmatpush3.bf16.msra.mxu0 %v45_v10  ;;  %v106_v14 = vsel %vm43_vm0, %v101_v8, 0 }
   0x6   :  { %11 = vsyncpa [#allocation4], 0  ;;  %385 = vmatpush3.bf16.msra.mxu1 %v106_v14  ;;  %390 = vmatprep.subr.bf16.mxu0 %v435_v3  ;;  %v166_v17 = vsel %vm43_vm0, %v161_v12, 0  ;;  %v226_v18 = vsel %vm43_vm0, %v221_v16, 0  ;;  %v359_v19 = vld [vmem:[%s566_s0 + $0x20] sm:$0xff]  ;;  %v360_v20 = vld [vmem:[%s566_s0 + $0x28] sm:$0xff] }
   0x7   :  { %396 = vmatprep.subr.bf16.mxu1 %v435_v3  ;;  %v363_v21 = vld [vmem:[%s566_s0 + $0x30] sm:$0xff]  ;;  %v364_v22 = vld [vmem:[%s566_s0 + $0x38] sm:$0xff]  ;;  %v158_v23 = vpack.c.bf16 %v360_v20, %v359_v19  ;;  %v367_v57 = vld [vmem:[%s568_s2] ss:$0 sm:$0xff]  ;;  %s437_s27 = smov [#allocation3]  }
   0x8   :  { %381 = vmatmul.mubr.msk.bf16.vlgmr.msra.gmra.mrb[0].mxu0 %vm39_vm3, %v36_v11  ;;  %v218_v24 = vpack.c.bf16 %v364_v22, %v363_v21  ;;  %v32_v25 = vld [vmem:[#allocation2] sm:$0xff]  ;;  %v288_v62 = vld [vmem:[%s569_s3 + $0x8] sm:$0xff]  ;;  %s343_s28 = sshll.u32 %s437_s27, 4  ;;  %s344_s28 = int_to_ptr.vmem [resolvable:$true] %s343_s28 }
   0x9   :  { %387 = vmatmul.mubr.msk.bf16.vlgmr.msra.gmra.mrb[0].mxu1 %vm39_vm3, %v98_v15  ;;  %391 = vmatpush3.bf16.msra.mxu0 %v166_v17  ;;  %v33_v27 = vld [vmem:[#allocation2 + $0x8] sm:$0xff]  ;;  %v287_v59 = vld [vmem:[%s569_s3] sm:$0xff]  ;;  %s411_s29 = scalar_lea.vmem %s344_s28, 256  ;;  %p416_p1 = scmp.lt.s32.totalorder %s344_s28, %s344_s28 }
   0xa   :  { %392 = vmatprep.mubr.msk.bf16.mxu0 %vm436_vm1, %v435_v3  ;;  %397 = vmatpush3.bf16.msra.mxu1 %v226_v18  ;;  %v368_v21 = vld [vmem:[%s570_s4] ss:$0 sm:$0xff]  ;;  %p412_p0 = scmp.ne.s32.totalorder %s344_s28, %s411_s29  ;;  %p417_p2 = scmp.lt.s32.totalorder %s411_s29, %s411_s29 }
   0xb   :  { %398 = vmatprep.mubr.msk.bf16.mxu1 %vm436_vm1, %v435_v3 }
   0xc   :  { %p418_p3 = por %p417_p2, %p416_p1 }
   0xe   :  { %p419_p4 = pnand %p418_p3, %p412_p0 }
  0x10   :  { %393 = vmatmul.mubr.msk.bf16.vlgmr.msra.gmra.mrb[4].mxu0 %vm39_vm3, %v158_v23  ;;  %v369_v23 = vld [vmem:[%s571_s5] ss:$0 sm:$0xff] }
  0x11   :  { %399 = vmatmul.mubr.msk.bf16.vlgmr.msra.gmra.mrb[4].mxu1 %vm39_vm3, %v218_v24 }
  0xdb   :  { %v81_v26 = vpop.f32.mrb[0].mxu0 }
  0xdc   :  { %v88_v28 = vadd.f32 %v81_v26, %v32_v25  ;;  %v382_v29 = vpop.f32.mrb[1].mxu0  ;;  %v142_v30 = vpop.f32.mrb[0].mxu1 }
  0xdd   :  { %v84_v31 = vpop.f32.mrb[2].mxu0  ;;  %v388_v32 = vpop.f32.mrb[1].mxu1 }
  0xde   :  { %91 = vst.msk [vmem:[#allocation2] sm:$0xff] %vm29_vm2, %v88_v28  ;;  %v89_v33 = vadd.f32 %v84_v31, %v33_v27  ;;  %v383_v34 = vpop.f32.mrb[3].mxu0  ;;  %v145_v35 = vpop.f32.mrb[2].mxu1 }
  0xdf   :  { %v389_v36 = vpop.f32.mrb[3].mxu1 }
  0xe0   :  { %92 = vst.msk [vmem:[#allocation2 + $0x8] sm:$0xff] %vm29_vm2, %v89_v33 }
  0xe3   :  { %v202_v37 = vpop.f32.mrb[4].mxu0 }
  0xe4   :  { %v394_v38 = vpop.f32.mrb[5].mxu0  ;;  %v262_v39 = vpop.f32.mrb[4].mxu1 }
  0xe5   :  { %v93_v40 = vld [vmem:[#allocation2] sm:$0xff]  ;;  %v205_v41 = vpop.f32.mrb[6].mxu0  ;;  %v400_v42 = vpop.f32.mrb[5].mxu1 }
  0xe6   :  { %v149_v43 = vadd.f32 %v142_v30, %v93_v40  ;;  %v395_v44 = vpop.f32.mrb[7].mxu0  ;;  %v265_v45 = vpop.f32.mrb[6].mxu1 }
  0xe7   :  { %v94_v46 = vld [vmem:[#allocation2 + $0x8] sm:$0xff]  ;;  %v401_v47 = vpop.f32.mrb[7].mxu1 }
  0xe8   :  { %151 = vst.msk [vmem:[#allocation2] sm:$0xff] %vm29_vm2, %v149_v43  ;;  %v150_v48 = vadd.f32 %v145_v35, %v94_v46 }
  0xea   :  { %152 = vst.msk [vmem:[#allocation2 + $0x8] sm:$0xff] %vm29_vm2, %v150_v48 }
  0xef   :  { %v153_v49 = vld [vmem:[#allocation2] sm:$0xff] }
  0xf0   :  { %v209_v50 = vadd.f32 %v202_v37, %v153_v49 }
  0xf1   :  { %v154_v51 = vld [vmem:[#allocation2 + $0x8] sm:$0xff] }
  0xf2   :  { %211 = vst.msk [vmem:[#allocation2] sm:$0xff] %vm29_vm2, %v209_v50  ;;  %v210_v52 = vadd.f32 %v205_v41, %v154_v51 }
  0xf4   :  { %212 = vst.msk [vmem:[#allocation2 + $0x8] sm:$0xff] %vm29_vm2, %v210_v52 }
  0xf9   :  { %v213_v53 = vld [vmem:[#allocation2] sm:$0xff] }
  0xfa   :  { %v269_v54 = vadd.f32 %v262_v39, %v213_v53 }
  0xfb   :  { %v214_v55 = vld [vmem:[#allocation2 + $0x8] sm:$0xff] }
  0xfc   :  { %271 = vst.msk [vmem:[#allocation2] sm:$0xff] %vm29_vm2, %v269_v54  ;;  %v270_v56 = vadd.f32 %v265_v45, %v214_v55 }
  0xfe   :  { %272 = vst.msk [vmem:[#allocation2 + $0x8] sm:$0xff] %vm29_vm2, %v270_v56 }
 0x103   :  { %v276_v58 = vld [vmem:[#allocation2] sm:$0xff] }
 0x104   :  { %v285_v60 = vadd.f32 %v367_v57, %v276_v58 }
 0x105   :  { %v277_v61 = vld [vmem:[#allocation2 + $0x8] sm:$0xff] }
 0x106   :  { %v289_v63 = vadd.f32 %v287_v59, %v285_v60  ;;  %v286_v0 = vadd.f32 %v367_v57, %v277_v61 }
 0x108   :  { %v291_v1 = vsel %vm29_vm2, %v289_v63, 0.0  ;;  %v290_v2 = vadd.f32 %v288_v62, %v286_v0 }
 0x109   :  { %292 = vadd.xlane.f32.xlu0 %v291_v1 }
 0x10a   :  { %v294_v3 = vsel %vm29_vm2, %v290_v2, 0.0 }
 0x10d   :  { %295 = vadd.xlane.f32.xlu0 %v294_v3 }
 0x196   :  { %v293_v4 = vpop.xlane.xlu0 %292 }
 0x197   :  { %v298_v5 = vmul.f32 0.03125, %v293_v4 }
 0x199   :  { %v300_v6 = vsub.f32 %v289_v63, %v298_v5 }
 0x19a   :  { %v296_v7 = vpop.xlane.xlu0 %295 }
 0x19b   :  { %v299_v8 = vmul.f32 0.03125, %v296_v7  ;;  %v302_v9 = vmul.f32 %v300_v6, %v300_v6 }
 0x19d   :  { %v301_v10 = vsub.f32 %v290_v2, %v299_v8  ;;  %v304_v11 = vsel %vm29_vm2, %v302_v9, 0.0 }
 0x19e   :  { %305 = vadd.xlane.f32.xlu1 %v304_v11 }
 0x19f   :  { %v303_v12 = vmul.f32 %v301_v10, %v301_v10 }
 0x1a1   :  { %v307_v13 = vsel %vm29_vm2, %v303_v12, 0.0 }
 0x1a2   :  { %308 = vadd.xlane.f32.xlu1 %v307_v13 }
 0x22b   :  { %v306_v14 = vpop.xlane.xlu1 %305 }
 0x22c   :  { %v310_v15 = vmul.f32 0.03125, %v306_v14 }
 0x22e   :  { %v312_v16 = vadd.f32 1e-05, %v310_v15 }
 0x22f   :  { %v309_v17 = vpop.xlane.xlu1 %308 }
 0x230   :  { %407 = vrsqrt.f32 %v312_v16  ;;  %v311_v18 = vmul.f32 0.03125, %v309_v17 }
 0x232   :  { %v313_v19 = vadd.f32 1e-05, %v311_v18 }
 0x234   :  { %409 = vrsqrt.f32 %v313_v19 }
 0x23a   :  { %v408_v20 = vpop.eup %407 }
 0x23b   :  { %v316_v22 = vmul.f32 %v408_v20, %v300_v6 }
 0x23d   :  { %v325_v24 = vmul.f32 %v368_v21, %v316_v22 }
 0x23e   :  { %v410_v25 = vpop.eup %409 }
 0x23f   :  { %v317_v26 = vmul.f32 %v410_v25, %v301_v10  ;;  %v334_v27 = vadd.f32 %v369_v23, %v325_v24 }
 0x241   :  { %v326_v28 = vmul.f32 %v368_v21, %v317_v26  ;;  %336 = vst.msk [vmem:[#allocation3] sm:$0xff] %vm29_vm2, %v334_v27 }
 0x243   :  { %v335_v29 = vadd.f32 %v369_v23, %v326_v28 }
 0x245   :  { %337 = vst.msk [vmem:[#allocation3 + $0x8] sm:$0xff] %vm29_vm2, %v335_v29 }
 0x246   :  { %422 = shalt.err (!%p419_p4)
}
 0x247   :  { %s423_s30 = scalar_lea.hbm %s572_s6, 256 }
 0x248   :  { %p424_p5 = scmp.ne.s32.totalorder %s572_s6, %s423_s30  ;;  %p427_p6 = scmp.lt.u32.totalorder %s423_s30, %s572_s6 }
 0x24a   :  { %p429_p7 = pnand %p427_p6, %p424_p5 }
 0x24c   :  { %432 = shalt.err (!%p429_p7)
}
 0x24d   :  { %s438_s11 = smov 128   ;;  %s439_s12 = smov 8  }
 0x24e   :  { %349 = dma.vmem_to_hbm [thread:$0]  %s344_s28, 256, %s572_s6, [#allocation4], %s438_s11, %s438_s11, %s439_s12  }
 0x24f   :  { %433 = dma.done.wait [#allocation4], 256  }
 0x250   :  { %434 = vsyncadd [#allocation4], 4294967040 }
 0x251   :  { %353 = vsyncpa [#allocation4], 1 }

// kernel: multi_head_attention.6
= control target key start
LH: loop header
LB: loop body
LE: loop exit
PB: predicated region body
PF: predicated region fallthrough
CT: control target
= control target key end

     0   :  { %vm19_vm0 = vcmask 64512   ;;  %v379_v0 = vmov 0.0   ;;  %vm380_vm1 = vmmov 0   ;;  %vm39_vm2 = vcmask 261120   ;;  %s523_s1 = inlined_call_operand.vmem [shape: f32[4,32,8], index: 1, kind: input, shape index: {}]   ;;  %s524_s0 = inlined_call_operand.vmem [shape: f32[16,32], index: 0, kind: input, shape index: {}]   ;;  %s525_s2 = inlined_call_operand.vmem [shape: f32[4,1,8], index: 2, kind: input, shape index: {}]   ;;  %s526_s3 = inlined_call_operand.vmem [shape: f32[4,16,8], index: 3, kind: output, shape index: {}]  }
   0x1   :  { %345 = vmatprep.subr.bf16.mxu0 %v379_v0  ;;  %353 = vmatprep.subr.bf16.mxu1 %v379_v0  ;;  %v33_v1 = vld [vmem:[%s523_s1] sm:$0xff]  ;;  %v34_v2 = vld [vmem:[%s523_s1 + $0x8] sm:$0xff]  ;;  %20 = vst.msk [vmem:[#allocation2] sm:$0xff] %vm19_vm0, %v379_v0  ;;  %21 = vst.msk [vmem:[#allocation2 + $0x8] sm:$0xff] %vm19_vm0, %v379_v0 }
   0x2   :  { %v314_v3 = vld [vmem:[%s523_s1 + $0x20] sm:$0xff]  ;;  %22 = vst.msk [vmem:[#allocation2 + $0x10] sm:$0xff] %vm19_vm0, %v379_v0  ;;  %23 = vst.msk [vmem:[#allocation2 + $0x18] sm:$0xff] %vm19_vm0, %v379_v0  ;;  %v37_v4 = vpack.c.bf16 %v34_v2, %v33_v1  ;;  %v315_v5 = vld [vmem:[%s523_s1 + $0x28] sm:$0xff]  ;;  %349 = vmatprep.mubr.msk.bf16.mxu0 %vm380_vm1, %v379_v0  ;;  %357 = vmatprep.mubr.msk.bf16.mxu1 %vm380_vm1, %v379_v0 }
   0x3   :  { %24 = vst.msk [vmem:[#allocation2 + $0x20] sm:$0xff] %vm19_vm0, %v379_v0  ;;  %25 = vst.msk [vmem:[#allocation2 + $0x28] sm:$0xff] %vm19_vm0, %v379_v0  ;;  %v35_v6 = vld [vmem:[%s523_s1 + $0x10] sm:$0xff]  ;;  %v36_v7 = vld [vmem:[%s523_s1 + $0x18] sm:$0xff]  ;;  %v97_v8 = vpack.c.bf16 %v315_v5, %v314_v3 }
   0x4   :  { %26 = vst.msk [vmem:[#allocation2 + $0x30] sm:$0xff] %vm19_vm0, %v379_v0  ;;  %27 = vst.msk [vmem:[#allocation2 + $0x38] sm:$0xff] %vm19_vm0, %v379_v0  ;;  %v316_v9 = vld [vmem:[%s523_s1 + $0x30] sm:$0xff]  ;;  %v317_v10 = vld [vmem:[%s523_s1 + $0x38] sm:$0xff]  ;;  %346 = vmatpush3.bf16.msra.mxu0 %v37_v4  ;;  %v38_v11 = vpack.c.bf16 %v36_v7, %v35_v6 }
   0x5   :  { %v28_v12 = vld [vmem:[%s524_s0] sm:$0xff]  ;;  %v29_v13 = vld [vmem:[%s524_s0 + $0x8] sm:$0xff]  ;;  %354 = vmatpush3.bf16.msra.mxu1 %v97_v8  ;;  %347 = vmatprep.subr.bf16.mxu0 %v379_v0  ;;  %v98_v14 = vpack.c.bf16 %v317_v10, %v316_v9  ;;  %v321_v22 = vld [vmem:[%s523_s1 + $0x50] sm:$0xff] }
   0x6   :  { %v319_v15 = vld [vmem:[%s523_s1 + $0x40] sm:$0xff]  ;;  %v320_v16 = vld [vmem:[%s523_s1 + $0x48] sm:$0xff]  ;;  %355 = vmatprep.subr.bf16.mxu1 %v379_v0  ;;  %v30_v19 = vpack.c.bf16 %v29_v13, %v28_v12  ;;  %v322_v23 = vld [vmem:[%s523_s1 + $0x58] sm:$0xff] }
   0x7   :  { %v324_v17 = vld [vmem:[%s523_s1 + $0x60] sm:$0xff]  ;;  %v325_v18 = vld [vmem:[%s523_s1 + $0x68] sm:$0xff]  ;;  %v152_v20 = vpack.c.bf16 %v320_v16, %v319_v15  ;;  %v326_v24 = vld [vmem:[%s523_s1 + $0x70] sm:$0xff]  ;;  %v153_v26 = vpack.c.bf16 %v322_v23, %v321_v22 }
   0x8   :  { %348 = vmatpush3.bf16.msra.mxu0 %v38_v11  ;;  %v207_v21 = vpack.c.bf16 %v325_v18, %v324_v17  ;;  %v327_v25 = vld [vmem:[%s523_s1 + $0x78] sm:$0xff]  ;;  %v31_v28 = vld [vmem:[#allocation2] sm:$0xff]  ;;  %v32_v31 = vld [vmem:[#allocation2 + $0x8] sm:$0xff] }
   0x9   :  { %356 = vmatpush3.bf16.msra.mxu1 %v98_v14  ;;  %361 = vmatprep.subr.bf16.mxu0 %v379_v0  ;;  %v208_v27 = vpack.c.bf16 %v327_v25, %v326_v24  ;;  %v90_v29 = vld [vmem:[#allocation2 + $0x10] sm:$0xff]  ;;  %v91_v35 = vld [vmem:[#allocation2 + $0x18] sm:$0xff]  ;;  %v329_v46 = vld [vmem:[%s525_s2] ss:$0 sm:$0xff] }
   0xa   :  { %369 = vmatprep.subr.bf16.mxu1 %v379_v0  ;;  %v145_v44 = vld [vmem:[#allocation2 + $0x20] sm:$0xff]  ;;  %v146_v48 = vld [vmem:[#allocation2 + $0x28] sm:$0xff] }
   0xb   :  { %350 = vmatmul.mubr.msk.bf16.vlgmr.msra.gmra.mrb[0].mxu0 %vm39_vm2, %v30_v19  ;;  %v200_v45 = vld [vmem:[#allocation2 + $0x30] sm:$0xff]  ;;  %v330_v49 = vld [vmem:[%s525_s2 + $0x1] ss:$0 sm:$0xff]  ;;  %v201_v53 = vld [vmem:[#allocation2 + $0x38] sm:$0xff] }
   0xc   :  { %358 = vmatmul.mubr.msk.bf16.vlgmr.msra.gmra.mrb[0].mxu1 %vm39_vm2, %v30_v19  ;;  %362 = vmatpush3.bf16.msra.mxu0 %v152_v20  ;;  %v331_v6 = vld [vmem:[%s525_s2 + $0x2] ss:$0 sm:$0xff]  ;;  %v332_v7 = vld [vmem:[%s525_s2 + $0x3] ss:$0 sm:$0xff] }
   0xd   :  { %370 = vmatpush3.bf16.msra.mxu1 %v207_v21  ;;  %363 = vmatprep.subr.bf16.mxu0 %v379_v0 }
   0xe   :  { %371 = vmatprep.subr.bf16.mxu1 %v379_v0  ;;  %365 = vmatprep.mubr.msk.bf16.mxu0 %vm380_vm1, %v379_v0 }
   0xf   :  { %373 = vmatprep.mubr.msk.bf16.mxu1 %vm380_vm1, %v379_v0 }
  0x10   :  { %364 = vmatpush3.bf16.msra.mxu0 %v153_v26 }
  0x11   :  { %372 = vmatpush3.bf16.msra.mxu1 %v208_v27 }
  0x13   :  { %366 = vmatmul.mubr.msk.bf16.vlgmr.msra.gmra.mrb[4].mxu0 %vm39_vm2, %v30_v19 }
  0x14   :  { %374 = vmatmul.mubr.msk.bf16.vlgmr.msra.gmra.mrb[4].mxu1 %vm39_vm2, %v30_v19 }
  0xde   :  { %v77_v30 = vpop.f32.mrb[0].mxu0 }
  0xdf   :  { %v84_v32 = vadd.f32 %v77_v30, %v31_v28  ;;  %v133_v33 = vpop.f32.mrb[0].mxu1  ;;  %v351_v34 = vpop.f32.mrb[1].mxu0 }
  0xe0   :  { %v140_v36 = vadd.f32 %v133_v33, %v90_v29  ;;  %v359_v37 = vpop.f32.mrb[1].mxu1  ;;  %v80_v38 = vpop.f32.mrb[2].mxu0 }
  0xe1   :  { %87 = vst.msk [vmem:[#allocation2] sm:$0xff] %vm19_vm0, %v84_v32  ;;  %v85_v39 = vadd.f32 %v80_v38, %v32_v31  ;;  %v136_v40 = vpop.f32.mrb[2].mxu1  ;;  %v352_v41 = vpop.f32.mrb[3].mxu0 }
  0xe2   :  { %142 = vst.msk [vmem:[#allocation2 + $0x10] sm:$0xff] %vm19_vm0, %v140_v36  ;;  %v141_v42 = vadd.f32 %v136_v40, %v91_v35  ;;  %v360_v43 = vpop.f32.mrb[3].mxu1 }
  0xe3   :  { %88 = vst.msk [vmem:[#allocation2 + $0x8] sm:$0xff] %vm19_vm0, %v85_v39 }
  0xe4   :  { %143 = vst.msk [vmem:[#allocation2 + $0x18] sm:$0xff] %vm19_vm0, %v141_v42 }
  0xe6   :  { %v188_v47 = vpop.f32.mrb[4].mxu0 }
  0xe7   :  { %v195_v50 = vadd.f32 %v188_v47, %v145_v44  ;;  %v243_v51 = vpop.f32.mrb[4].mxu1  ;;  %v367_v52 = vpop.f32.mrb[5].mxu0 }
  0xe8   :  { %v257_v54 = vld [vmem:[#allocation2] sm:$0xff]  ;;  %v250_v55 = vadd.f32 %v243_v51, %v200_v45  ;;  %v375_v56 = vpop.f32.mrb[5].mxu1  ;;  %v191_v57 = vpop.f32.mrb[6].mxu0 }
  0xe9   :  { %v293_v58 = vadd.f32 %v329_v46, %v257_v54  ;;  %v259_v59 = vld [vmem:[#allocation2 + $0x10] sm:$0xff]  ;;  %197 = vst.msk [vmem:[#allocation2 + $0x20] sm:$0xff] %vm19_vm0, %v195_v50  ;;  %v196_v60 = vadd.f32 %v191_v57, %v146_v48  ;;  %v246_v61 = vpop.f32.mrb[6].mxu1  ;;  %v368_v62 = vpop.f32.mrb[7].mxu0 }
  0xea   :  { %v295_v63 = vadd.f32 %v330_v49, %v259_v59  ;;  %v258_v0 = vld [vmem:[#allocation2 + $0x8] sm:$0xff]  ;;  %252 = vst.msk [vmem:[#allocation2 + $0x30] sm:$0xff] %vm19_vm0, %v250_v55  ;;  %v251_v1 = vadd.f32 %v246_v61, %v201_v53  ;;  %v376_v2 = vpop.f32.mrb[7].mxu1 }
  0xeb   :  { %301 = vst.msk [vmem:[%s526_s3] sm:$0xff] %vm19_vm0, %v293_v58  ;;  %v294_v3 = vadd.f32 %v329_v46, %v258_v0  ;;  %v260_v4 = vld [vmem:[#allocation2 + $0x18] sm:$0xff]  ;;  %198 = vst.msk [vmem:[#allocation2 + $0x28] sm:$0xff] %vm19_vm0, %v196_v60 }
  0xec   :  { %303 = vst.msk [vmem:[%s526_s3 + $0x10] sm:$0xff] %vm19_vm0, %v295_v63  ;;  %v296_v5 = vadd.f32 %v330_v49, %v260_v4  ;;  %253 = vst.msk [vmem:[#allocation2 + $0x38] sm:$0xff] %vm19_vm0, %v251_v1 }
  0xed   :  { %302 = vst.msk [vmem:[%s526_s3 + $0x8] sm:$0xff] %vm19_vm0, %v294_v3 }
  0xee   :  { %304 = vst.msk [vmem:[%s526_s3 + $0x18] sm:$0xff] %vm19_vm0, %v296_v5 }
  0xf0   :  { %v261_v8 = vld [vmem:[#allocation2 + $0x20] sm:$0xff] }
  0xf1   :  { %v297_v9 = vadd.f32 %v331_v6, %v261_v8  ;;  %v263_v10 = vld [vmem:[#allocation2 + $0x30] sm:$0xff] }
  0xf2   :  { %v299_v11 = vadd.f32 %v332_v7, %v263_v10  ;;  %v262_v12 = vld [vmem:[#allocation2 + $0x28] sm:$0xff] }
  0xf3   :  { %305 = vst.msk [vmem:[%s526_s3 + $0x20] sm:$0xff] %vm19_vm0, %v297_v9  ;;  %v298_v13 = vadd.f32 %v331_v6, %v262_v12  ;;  %v264_v14 = vld [vmem:[#allocation2 + $0x38] sm:$0xff] }
  0xf4   :  { %307 = vst.msk [vmem:[%s526_s3 + $0x30] sm:$0xff] %vm19_vm0, %v299_v11  ;;  %v300_v15 = vadd.f32 %v332_v7, %v264_v14 }
  0xf5   :  { %306 = vst.msk [vmem:[%s526_s3 + $0x28] sm:$0xff] %vm19_vm0, %v298_v13 }
  0xf6   :  { %308 = vst.msk [vmem:[%s526_s3 + $0x38] sm:$0xff] %vm19_vm0, %v300_v15 }

// kernel: multi_head_attention.8
= control target key start
LH: loop header
LB: loop body
LE: loop exit
PB: predicated region body
PF: predicated region fallthrough
CT: control target
= control target key end

     0   :  { %s1023_s0 = inlined_call_operand.vmem [shape: f32[4,16,8], index: 0, kind: input, shape index: {}]   ;;  %s1024_s1 = inlined_call_operand.vmem [shape: f32[4,16,8], index: 1, kind: input, shape index: {}]   ;;  %s1025_s2 = inlined_call_operand.vmem [shape: f32[4,16,8], index: 2, kind: input, shape index: {}]   ;;  %s1026_s3 = inlined_call_operand.vmem [shape: f32[4,16,8], index: 3, kind: output, shape index: {0}]   ;;  %s1027_s4 = inlined_call_operand.hbm [shape: f32[8,8,8], index: 4, kind: output, shape index: {1}]  }
   0x1   :  { %1028 = sst [smem:[#allocation5_spill]] %s1023_s0 }
   0x2   :  { %1029 = sst [smem:[#allocation6_spill]] %s1024_s1 }
   0x3   :  { %10 = vsyncpa [#allocation3], 0 }
   0x4   :  { %12 = vsyncpa [#allocation3 + $0x1], 0  ;;  %s870_s15 = smov 0   ;;  %s872_s16 = smov 0  }
   0x5   :  { %s874_s17 = smov 0   ;;  %s876_s18 = smov 0  }
   0x6   :  { %s878_s19 = smov 0   ;;  %s880_s20 = smov 0  }
   0x7   :  { %s882_s21 = smov 0   ;;  %s884_s22 = smov 0  }
   0x8 LB: > { %s630_s23 = sadd.s32 4294967295, %s840_s22   ;;  %s33_s24 = sadd.s32 1, %s832_s20  ;;  %s840_s22 = sphi %s884_s22, %s18_s22   ;;  %s836_s21 = sphi %s882_s21, %s1040_s21   ;;  %s832_s20 = sphi %s880_s20, %s1039_s20   ;;  %s828_s19 = sphi %s878_s19, %s1038_s19   ;;  %s824_s18 = sphi %s876_s18, %s1037_s18   ;;  %s820_s17 = sphi %s874_s17, %s1036_s17   ;;  %s816_s16 = sphi %s872_s16, %s1035_s16   ;;  %s812_s15 = sphi %s870_s15, %s1034_s15  }
   0x9   : > { %s37_s25 = sadd.s32 1, %s836_s21  ;;  %p35_p0 = scmp.ge.s32.totalorder %s33_s24, 2 }
   0xa   : > { %s632_s26 = sshll.u32 %s836_s21, 1  ;;  %s631_s27 = sadd.s32 4294967294, %s840_s22  }
   0xb   : > { %s158_s28 = sadd.s32 %s832_s20, %s632_s26  ;;  %s1042_s24 = smov (%p35_p0, %s33_s24), 0 }
   0xc   : > { %s1044_s25 = smov (!%p35_p0, %s37_s25), %s836_s21  ;;  %p176_p1 = scmp.ne.s32.totalorder %s820_s17, %s816_s16 }
   0xd   : > { %p177_p2 = scmp.eq.s32.totalorder %s630_s23, 7  ;;  %p39_p3 = scmp.ge.s32.totalorder %s1044_s25, 4 }
   0xe   : > { %p182_p4 = scmp.ne.s32.totalorder %s816_s16, %s812_s15  ;;  %p183_p6 = scmp.eq.s32.totalorder %s631_s27, 7 }
   0xf   : > { %p923_p5 = por %p177_p2, %p176_p1  ;;  %s1046_s25 = smov (%p39_p3, %s1044_s25), 0 }
  0x10   : > { %p929_p7 = por %p183_p6, %p182_p4  ;;  %p636_p8 = scmp.ge.s32.totalorder %s840_s22, 1 }
  0x11   : > { %s633_s5 = sshll.u32 %s1046_s25, 1  ;;  %p236_p9 = scmp.lt.s32.totalorder %s840_s22, 9 }
  0x12   : > { %s160_s6 = sadd.s32 %s633_s5, %s1042_s24  ;;  %s166_s7 = sadd.s32 1, %s820_s17 }
  0x13   : > { %s161_s8 = ssub.s32 %s158_s28, %s160_s6  ;;  %p237_p10 = pnand %p636_p8, %p236_p9 }
  0x14   : > { %p164_p11 = scmp.eq.s32.totalorder %s161_s8, 0  ;;  %p292_p12 = scmp.lt.s32.totalorder (!%p237_p10), %s828_s19, 3  ;;  %v842_v0 = vmov (!%p237_p10), 0.0   ;;  %vm843_vm0 = vmmov (!%p237_p10), 0   ;;  %vm334_vm1 = vcmask (!%p237_p10), 64512   ;;  %vm400_vm2 = vcmask (!%p237_p10), 1043456  }
  0x15   : > { %240 = sbr.rel (%p237_p10) target bundleno = 790 (0x316), region = 32  ;;  %p294_p13 = scmp.lt.s32.totalorder (!%p237_p10), %s824_s18, 1  ;;  %657 = vmatprep.subr.bf16.mxu0 (!%p237_p10), %v842_v0  ;;  %659 = vmatprep.mubr.msk.bf16.mxu0 (!%p237_p10), %vm843_vm0, %v842_v0 }
  0x16   : > { %s939_s9 = scalar_select %p164_p11, %s820_s17, %s166_s7  }
  0x17   : > { %663 = vmatprep.subr.bf16.mxu1 (!%p237_p10), %v842_v0  ;;  %665 = vmatprep.mubr.msk.bf16.mxu1 (!%p237_p10), %vm843_vm0, %v842_v0  ;;  %s1032_s1 = sld [smem:[#allocation6_spill]] (!%p237_p10)  ;;  %s1033_s0 = sld [smem:[#allocation5_spill]] (!%p237_p10) }
  0x18   : > { %s649_s23 = sshll.u32 (!%p237_p10), %s828_s19, 1 }
  0x19   : > { %s467_s26 = sadd.s32 (!%p237_p10), %s824_s18, %s649_s23 }
  0x1c   : > { %s293_s10 = scalar_select %p292_p12, %s828_s19, 3 }
  0x1d   : > { %s295_s11 = scalar_select %p294_p13, %s824_s18, 1 }
  0x1e   : > { %s638_s12 = sshll.u32 %s293_s10, 1 }
  0x1f   : > { %s297_s13 = sadd.s32 %s638_s12, %s295_s11  ;;  %s288_s11 = sand.u32 1, %s816_s16  }
  0x20   : > { %s945_s14 = sshll.u32 %s297_s13, 3  ;;  %s637_s12 = sshll.u32 %s288_s11, 3 }
  0x21   : > { %s308_s27 = scalar_lea.vmem %s1032_s1, %s945_s14  ;;  %s299_s6 = scalar_lea.vmem %s1033_s0, %s945_s14 }
  0x22   : > { %v332_v1 = vld [vmem:[%s308_s27] sm:$0xff]  ;;  %s316_s10 = scalar_lea.vmem %s1025_s2, %s945_s14  ;;  %s290_s13 = scalar_lea.vmem [#allocation2], %s637_s12 }
  0x23   : > { %v333_v2 = vpack.c.bf16 %v332_v1, %v332_v1  ;;  %v330_v4 = vld [vmem:[%s299_s6] sm:$0xff]  ;;  %s650_s27 = sshll.u32 %s467_s26, 7  ;;  %s475_s28 = sshll.u32 %s290_s13, 4  ;;  %s476_s28 = int_to_ptr.vmem [resolvable:$true] %s475_s28 }
  0x24   : > { %v331_v5 = vpack.c.bf16 %v330_v4, %v330_v4  ;;  %v395_v17 = vld [vmem:[%s316_s10] sm:$0xff]  ;;  %s971_s7 = scalar_lea.hbm %s1027_s4, %s650_s27  ;;  %s455_s8 = scalar_lea.sflag [#allocation3], %s288_s11 }
  0x25   : > { %v339_v3 = vsel %vm334_vm1, %v333_v2, 0  ;;  %v396_v18 = vpack.c.bf16 %v395_v17, %v395_v17  ;;  %s746_s10 = scalar_lea.vmem %s476_s28, 128  ;;  %s844_s12 = smov [#allocation2]  }
  0x26   : > { %658 = vmatpush3.bf16.xpose.msra.mxu0 %v339_v3  ;;  %p747_p0 = scmp.ne.s32.totalorder %s476_s28, %s746_s10  ;;  %s750_s0 = sshll.u32 %s844_s12, 4  ;;  %s751_s0 = int_to_ptr.vmem [resolvable:$false] %s750_s0 }
  0x27   : > { %v402_v19 = vsel %vm400_vm2, %v396_v18, 0  ;;  %s752_s1 = scalar_lea.vmem %s751_s0, 256  ;;  %p753_p3 = scmp.lt.s32.totalorder %s476_s28, %s751_s0 }
  0x28   : > { %664 = vmatpush3.bf16.msra.mxu1 %v402_v19  ;;  %p748_p1 = pnand %p747_p0, %p923_p5  ;;  %p754_p4 = scmp.lt.s32.totalorder %s752_s1, %s746_s10 }
  0x2a   : > { %p749_p2 = pneg %p748_p1  ;;  %p755_p6 = por %p754_p4, %p753_p3 }
  0x2c   : > { %p756_p8 = pnand %p755_p6, %p749_p2 }
  0x2d   : > { %660 = vmatmul.mubr.msk.bf16.vlgmr.msra.gmra.mrb[0].mxu0 %vm334_vm1, %v331_v5 }
 0x100   : > { %v375_v6 = vpop.f32.mrb[0].mxu0 }
 0x101   : > { %v381_v7 = vmul.f32 0.35355338, %v375_v6  ;;  %v661_v8 = vpop.f32.mrb[1].mxu0 }
 0x102   : > { %v378_v9 = vpop.f32.mrb[2].mxu0 }
 0x103   : > { %v662_v10 = vpop.f32.mrb[3].mxu0  ;;  %v382_v11 = vsel %vm334_vm1, %v381_v7, -inf }
 0x104   : > { %383 = vmax.xlane.f32.xlu0 %v382_v11 }
 0x191   : > { %v384_v12 = vpop.xlane.xlu0 %383 }
 0x192   : > { %v385_v13 = vsub.f32 %v381_v7, %v384_v12 }
 0x194   : > { %v386_v14 = vmul.f32 1.442695, %v385_v13 }
 0x196   : > { %742 = vpow2.f32 %v386_v14 }
 0x1a0   : > { %v743_v15 = vpop.eup %742 }
 0x1a1   : > { %v388_v16 = vsel %vm334_vm1, %v743_v15, 0.0 }
 0x1a2   : > { %389 = vadd.xlane.f32.xlu0 %v388_v16 }
 0x22f   : > { %v390_v20 = vpop.xlane.xlu0 %389 }
 0x230   : > { %744 = vrcp.f32 %v390_v20 }
 0x23a   : > { %v745_v21 = vpop.eup %744 }
 0x23b   : > { %v392_v22 = vmul.f32 %v745_v21, %v743_v15 }
 0x23d   : > { %v394_v23 = vpack.c.bf16 %v392_v22, %v392_v22  ;;  %393 = vst.msk [vmem:[%s290_s13] sm:$0xff] %vm334_vm1, %v392_v22 }
 0x23f   : > { %666 = vmatmul.mubr.msk.bf16.vlgmr.msra.gmra.mrb[0].mxu1 %vm334_vm1, %v394_v23 }
 0x240   : > { %759 = shalt.err (!%p756_p8)
}
 0x241   : > { %s760_s18 = scalar_lea.hbm %s971_s7, 128  ;;  %s764_s13 = scalar_lea.hbm %s1027_s4, 1024 }
 0x242   : > { %p761_p9 = scmp.ne.s32.totalorder %s971_s7, %s760_s18  ;;  %p765_p12 = scmp.lt.u32.totalorder %s971_s7, %s1027_s4 }
 0x243   : > { %p766_p13 = scmp.lt.u32.totalorder %s764_s13, %s760_s18  ;;  %p768_p1 = scmp.lt.u32.totalorder %s760_s18, %s971_s7 }
 0x244   : > { %p762_p10 = pnand %p761_p9, %p923_p5 }
 0x245   : > { %p767_p0 = por %p766_p13, %p765_p12 }
 0x246   : > { %p763_p11 = pneg %p762_p10 }
 0x247   : > { %p769_p2 = por %p768_p1, %p767_p0 }
 0x249   : > { %p770_p3 = pnand %p769_p2, %p763_p11 }
 0x24b   : > { %773 = shalt.err (!%p770_p3)
}
 0x24c   : > { %669 = dma.vmem_to_hbm [thread:$0]  (%p923_p5), %s476_s28, 128, %s971_s7, %s455_s8  }
 0x24d   : > { %s325_s27 = scalar_lea.vmem %s1026_s3, %s945_s14 }
 0x312   : > { %v438_v24 = vpop.f32.mrb[0].mxu1 }
 0x313   : > { %444 = vst.msk [vmem:[%s325_s27] sm:$0xff] %vm334_vm1, %v438_v24  ;;  %v667_v25 = vpop.f32.mrb[1].mxu1 }
 0x314   : > { %v441_v26 = vpop.f32.mrb[2].mxu1 }
 0x315   : > { %v668_v27 = vpop.f32.mrb[3].mxu1 }
 0x316 PF: > { %p675_p4 = scmp.ge.s32.totalorder %s840_s22, 2  ;;  %s499_s5 = sand.u32 1, %s812_s15  }
 0x317   : > { %s500_s29 = scalar_lea.sflag [#allocation3], %s499_s5 }
 0x318   : > { %p672_p6 = pnand %p675_p4, %p929_p7 }
 0x31a   : > { %807 = dma.done.wait (!%p672_p6), %s500_s29, 128  }
 0x31b   : > { %809 = vsyncadd (!%p672_p6), %s500_s29, 4294967168  ;;  %s18_s22 = sadd.s32 1, %s840_s22   ;;  %s1034_s15 = smov %s816_s16 }
 0x31c   : > { %p15_p5 = scmp.ge.s32.totalorder %s18_s22, 10   ;;  %s1035_s16 = smov %s820_s17 }
 0x31d   : > { %s1036_s17 = smov %s939_s9  ;;  %s1037_s18 = smov %s832_s20 }
 0x31e   : > { %s1038_s19 = smov %s836_s21  ;;  %s1039_s20 = smov %s1042_s24 }
 0x31f   : > { %s1040_s21 = smov %s1046_s25  ;;  %17 = sbr.rel (!%p15_p5) target bundleno = 8 (0x8), region = 85 }
 0x326   :  { %505 = vsyncpa [#allocation3], 1 }
 0x327   :  { %507 = vsyncpa [#allocation3 + $0x1], 1 }

</bundles_post_ra>
